<compile_context>
chip_gen: v7x
topology: tpu7x:2x2x1
jax: 0.10.0
libtpu: 0.0.40
codegen_flags: <defaults>
</compile_context>

<pallas_src>
import jax
import jax.numpy as jnp
from jax import lax
from jax.experimental import pallas as pl
from jax.experimental.pallas import tpu as pltpu

EPS = 1e-5
OUT_PAD = 128  # final layer padded 10 -> 128 output lanes (lane-dense store path)


# ----------------------------------------------------------------------------------
# Single-block fused kernel (small batches: whole batch resident in VMEM)
# ----------------------------------------------------------------------------------
def _bn_relu(y, g_ref, beta_ref):
    """Training-mode BatchNorm1d folded into one scale/shift FMA, then ReLU.

    Two-pass (centered) variance in f32 to avoid cancellation.  `y` is the bias-free
    f32 matmul result (the linear bias cancels against the batch-mean subtraction).
    """
    mean = jnp.mean(y, axis=0, keepdims=True)                       # (1, F)
    var = jnp.mean(jnp.square(y - mean), axis=0, keepdims=True)     # biased batch var
    scale = g_ref[...] * lax.rsqrt(var + EPS)
    shift = beta_ref[...] - mean * scale
    return jnp.maximum(y * scale + shift, 0.0)


def _fused_kernel(x_ref,
                  w1_hbm, g1_ref, be1_ref,
                  w234_hbm,
                  g2_ref, be2_ref,
                  g3_ref, be3_ref,
                  b4_ref,
                  o_ref,
                  w1_buf, w234_buf, sem):
    # Kick off all weight DMAs immediately.  W1 comes in two K-chunks so the layer-1
    # matmul can start as soon as the first 512 rows land; W2|W3|W4 is one fused copy.
    cp1a = pltpu.make_async_copy(w1_hbm.at[0:512], w1_buf.at[0:512], sem.at[0])
    cp1b = pltpu.make_async_copy(w1_hbm.at[512:784], w1_buf.at[512:784], sem.at[1])
    cp234 = pltpu.make_async_copy(w234_hbm, w234_buf, sem.at[2])
    cp1a.start()
    cp1b.start()
    cp234.start()

    # In-kernel f32 -> bf16 cast of the input (VPU work that hides DMA latency).
    xb = x_ref[...].astype(jnp.bfloat16)

    # Layer 1: (B,784) @ (784,512), split along K to overlap with the W1 chunk DMA.
    cp1a.wait()
    y1 = jnp.dot(xb[:, 0:512], w1_buf[0:512, :], preferred_element_type=jnp.float32)
    cp1b.wait()
    y1 = y1 + jnp.dot(xb[:, 512:784], w1_buf[512:784, :],
                      preferred_element_type=jnp.float32)
    h = _bn_relu(y1, g1_ref, be1_ref)

    # Layers 2-4 read slices of the fused W2|W3|W4 VMEM image.
    cp234.wait()
    h = _bn_relu(
        jnp.dot(h.astype(jnp.bfloat16), w234_buf[0:512, :],
                preferred_element_type=jnp.float32),
        g2_ref, be2_ref)
    h = _bn_relu(
        jnp.dot(h.astype(jnp.bfloat16), w234_buf[512:768, 0:128],
                preferred_element_type=jnp.float32),
        g3_ref, be3_ref)
    out = jnp.dot(h.astype(jnp.bfloat16), w234_buf[768:896, 0:128],
                  preferred_element_type=jnp.float32) + b4_ref[...]
    o_ref[...] = out                                                # (B, 128) lane-dense


def _fused_vmem_bytes(B):
    weights = 2 * (784 * 512 + 896 * 256) * 2            # bf16 scratch copies (+slack)
    acts = B * (784 * 4 + 784 * 2 + (512 + 256 + 128) * (4 + 2) + 2 * OUT_PAD * 4)
    est = weights + acts + (8 << 20)                      # headroom for temporaries
    return int(min(max(est, 32 << 20), 100 << 20))


def _fused_forward(x2d, params):
    B = x2d.shape[0]
    args = (x2d,
            params["w1"], params["g1"], params["beta1"],
            params["w234"],
            params["g2"], params["beta2"],
            params["g3"], params["beta3"],
            params["b4"])
    vmem = pl.BlockSpec(memory_space=pltpu.MemorySpace.VMEM)
    hbm = pl.BlockSpec(memory_space=pl.ANY)
    in_specs = [vmem,              # x (f32; cast to bf16 in-kernel)
                hbm, vmem, vmem,   # w1 in HBM (manual 2-chunk stream), g1, beta1
                hbm,               # fused W2|W3|W4 image in HBM (single DMA)
                vmem, vmem,        # g2, beta2
                vmem, vmem,        # g3, beta3
                vmem]              # b4

    flops = 2 * B * (784 * 512 + 512 * 256 + 256 * 128 + 128 * OUT_PAD)
    bytes_accessed = (4 * B * 784                          # f32 input
                      + 2 * (784 * 512 + 896 * 256)        # bf16 weights
                      + 4 * (2 * (512 + 256 + 128) + OUT_PAD)
                      + 4 * B * OUT_PAD)
    cost = pl.CostEstimate(flops=flops,
                           transcendentals=512 + 256 + 128,
                           bytes_accessed=bytes_accessed)

    return pl.pallas_call(
        _fused_kernel,
        out_shape=jax.ShapeDtypeStruct((B, OUT_PAD), jnp.float32),
        in_specs=in_specs,
        out_specs=vmem,
        scratch_shapes=[
            pltpu.VMEM((784, 512), jnp.bfloat16),    # W1 VMEM home
            pltpu.VMEM((896, 256), jnp.bfloat16),    # fused W2|W3|W4 VMEM home
            pltpu.SemaphoreType.DMA((3,)),
        ],
        compiler_params=pltpu.CompilerParams(vmem_limit_bytes=_fused_vmem_bytes(B)),
        cost_estimate=cost,
    )(*args)


# ----------------------------------------------------------------------------------
# Batch-tiled path (large batches): one pallas_call per layer, grid over batch tiles.
# Per-tile (sum, centered-M2) stats are combined exactly in the wrapper between
# passes, so the batch axis is fully "parallel" (v7x megacore shards it).
# ----------------------------------------------------------------------------------
def _make_pass_kernel(apply_bn_in, has_bias, emit_stats, tile_m):
    def kernel(*refs):
        i = 0
        yprev_ref = refs[i]; i += 1
        if apply_bn_in:
            scale_ref = refs[i]
            shift_ref = refs[i + 1]
            i += 2
        w_ref = refs[i]; i += 1
        if has_bias:
            b_ref = refs[i]; i += 1
        y_ref = refs[i]; i += 1
        if emit_stats:
            sum_ref = refs[i]
            m2_ref = refs[i + 1]

        h = yprev_ref[...]                                   # f32 (tile_m, F_in)
        if apply_bn_in:
            # previous layer's BN folded to one FMA, then ReLU
            h = jnp.maximum(h * scale_ref[...] + shift_ref[...], 0.0)
        y = jnp.dot(h.astype(jnp.bfloat16), w_ref[...],
                    preferred_element_type=jnp.float32)
        if has_bias:
            y = y + b_ref[...]
        y_ref[...] = y
        if emit_stats:
            s = jnp.sum(y, axis=0, keepdims=True)            # (1, F) per-tile sum
            m2 = jnp.sum(jnp.square(y - s * (1.0 / tile_m)),
                         axis=0, keepdims=True)              # centered per-tile M2
            sum_ref[...] = s[None]                           # (1, 1, F)
            m2_ref[...] = m2[None]
    return kernel


def _pass_vmem_bytes(tile_m, fin, fout):
    est = (2 * tile_m * fin * 4        # input block (double-buffered)
           + 2 * tile_m * fout * 4     # output block (double-buffered)
           + 2 * fin * fout * 2        # resident bf16 weight
           + tile_m * (fin + fout) * 2 # bf16 MXU operand temporaries
           + 16 * fout * 4             # stats blocks, scale/shift
           + (8 << 20))                # headroom
    return int(min(max(est, 32 << 20), 100 << 20))  # fits v7x's 64 MiB for tile=256


def _layer_pass(yprev, w, scale, shift, bias, emit_stats, tile_m):
    B, fin = yprev.shape
    fout = w.shape[1]
    nt = B // tile_m
    apply_bn = scale is not None
    has_bias = bias is not None

    in_specs = [pl.BlockSpec((tile_m, fin), lambda t: (t, 0))]
    args = [yprev]
    if apply_bn:
        in_specs += [pl.BlockSpec((1, fin), lambda t: (0, 0)),
                     pl.BlockSpec((1, fin), lambda t: (0, 0))]
        args += [scale, shift]
    in_specs.append(pl.BlockSpec((fin, fout), lambda t: (0, 0)))   # resident weight
    args.append(w)
    if has_bias:
        in_specs.append(pl.BlockSpec((1, fout), lambda t: (0, 0)))
        args.append(bias)

    out_shapes = [jax.ShapeDtypeStruct((B, fout), jnp.float32)]
    out_specs = [pl.BlockSpec((tile_m, fout), lambda t: (t, 0))]
    if emit_stats:
        out_shapes += [jax.ShapeDtypeStruct((nt, 1, fout), jnp.float32),
                       jax.ShapeDtypeStruct((nt, 1, fout), jnp.float32)]
        out_specs += [pl.BlockSpec((1, 1, fout), lambda t: (t, 0, 0)),
                      pl.BlockSpec((1, 1, fout), lambda t: (t, 0, 0))]

    cost = pl.CostEstimate(flops=2 * B * fin * fout, transcendentals=0,
                           bytes_accessed=4 * B * fin + 2 * fin * fout + 4 * B * fout)

    outs = pl.pallas_call(
        _make_pass_kernel(apply_bn, has_bias, emit_stats, tile_m),
        grid=(nt,),
        in_specs=in_specs,
        out_specs=out_specs,
        out_shape=out_shapes,
        compiler_params=pltpu.CompilerParams(
            dimension_semantics=("parallel",),          # batch tiles -> v7x megacore
            vmem_limit_bytes=_pass_vmem_bytes(tile_m, fin, fout)),
        cost_estimate=cost,
    )(*args)
    if emit_stats:
        return outs[0], outs[1], outs[2]
    return outs[0]


def _finalize_bn(tile_sums, tile_m2s, B, tile_m, gamma, beta):
    """Exact (Chan) combine of per-tile (sum, centered M2) -> folded BN scale/shift."""
    sums = tile_sums[:, 0, :]                                    # (nt, F)
    m2s = tile_m2s[:, 0, :]                                      # (nt, F)
    mean = jnp.sum(sums, axis=0, keepdims=True) / B              # (1, F)
    tile_mean = sums / tile_m                                    # (nt, F)
    m2 = (jnp.sum(m2s, axis=0, keepdims=True)
          + tile_m * jnp.sum(jnp.square(tile_mean - mean), axis=0, keepdims=True))
    var = m2 / B                                                 # biased (training BN)
    scale = gamma * lax.rsqrt(var + EPS)
    shift = beta - mean * scale
    return scale, shift


def _tiled_forward(x2d, params, tile_m):
    B = x2d.shape[0]
    y1, s1, q1 = _layer_pass(x2d, params["w1"], None, None, None, True, tile_m)
    sc1, sh1 = _finalize_bn(s1, q1, B, tile_m, params["g1"], params["beta1"])
    y2, s2, q2 = _layer_pass(y1, params["w2"], sc1, sh1, None, True, tile_m)
    sc2, sh2 = _finalize_bn(s2, q2, B, tile_m, params["g2"], params["beta2"])
    y3, s3, q3 = _layer_pass(y2, params["w3"], sc2, sh2, None, True, tile_m)
    sc3, sh3 = _finalize_bn(s3, q3, B, tile_m, params["g3"], params["beta3"])
    return _layer_pass(y3, params["w4"], sc3, sh3, params["b4"], False, tile_m)


# ----------------------------------------------------------------------------------
# Public wrapper
# ----------------------------------------------------------------------------------
def _pick_batch_tile(B, preferred):
    """Return a batch-tile size, or None -> single fused block (whole batch in VMEM)."""
    if B <= max(256, preferred):
        return None
    for t in (preferred, 256, 128, 64, 32, 16, 8):
        if t <= B and B % t == 0:
            return t
    return None   # TODO(synk): mask-padded ragged batch tiles for non-divisible B


def net_forward(x, params, epoch=0, *, batch_tile=256, return_padded=False):
    """JAX wrapper mirroring Net.forward(x, epoch). `epoch` is unused (as in PyTorch)."""
    del epoch
    B = x.shape[0]
    # Reshape only -- the f32->bf16 cast happens inside the kernel.
    x2d = x.reshape(B, -1).astype(jnp.float32)

    tile_m = _pick_batch_tile(B, batch_tile)
    if tile_m is None:
        out = _fused_forward(x2d, params)
    else:
        out = _tiled_forward(x2d, params, tile_m)
    if return_padded:
        return out                # (B, 128) lane-dense; cols 10: are zero-weight junk
    return out[:, :10]


def init_params(key):
    """Deterministic synthetic params. PyTorch Linear stores W as (out, in); we
    pre-transpose to (in, out) so kernels do x @ W.  Weights are bf16.  b1-b3 are kept
    only for the pure-JAX reference (training-mode BN cancels them exactly)."""
    dims = [(784, 512), (512, 256), (256, 128), (128, 10)]
    params = {}
    for i, (fin, fout) in enumerate(dims, start=1):
        key, kw, kb = jax.random.split(key, 3)
        bound = 1.0 / jnp.sqrt(jnp.float32(fin))
        w_torch = jax.random.uniform(kw, (fout, fin), jnp.float32, -bound, bound)
        b = jax.random.uniform(kb, (fout,), jnp.float32, -bound, bound)
        w = jnp.transpose(w_torch)                               # (fin, fout)
        if i == 4:
            w = jnp.pad(w, ((0, 0), (0, OUT_PAD - fout)))        # lane-dense head
            b = jnp.pad(b, (0, OUT_PAD - fout))
        params[f"w{i}"] = w.astype(jnp.bfloat16)
        params[f"b{i}"] = b.reshape(1, -1).astype(jnp.float32)
        if i <= 3:  # BatchNorm1d affine params (fresh module: gamma=1, beta=0)
            params[f"g{i}"] = jnp.ones((1, fout), jnp.float32)
            params[f"beta{i}"] = jnp.zeros((1, fout), jnp.float32)
    # Fused W2|W3|W4 HBM image for the single-block kernel: one (896, 256) bf16 buffer
    # => a single DMA descriptor.  Rows [0:512]=W2, [512:768]=W3 (cols 0:128),
    # [768:896]=W4 padded head (cols 0:128); the extra columns are zeros.
    w3p = jnp.pad(params["w3"], ((0, 0), (0, 128)))
    w4p = jnp.pad(params["w4"], ((0, 0), (0, 128)))
    params["w234"] = jnp.concatenate([params["w2"], w3p, w4p], axis=0)
    return params


def reference_forward(x, params):
    """Pure-JAX reference (bias kept, canonical two-pass BN), same bf16 matmul path."""
    h = x.reshape(x.shape[0], -1).astype(jnp.float32)
    for i in range(1, 4):
        y = jnp.dot(h.astype(jnp.bfloat16), params[f"w{i}"],
                    preferred_element_type=jnp.float32) + params[f"b{i}"]
        mean = jnp.mean(y, axis=0, keepdims=True)
        var = jnp.mean((y - mean) ** 2, axis=0, keepdims=True)
        y = (y - mean) / jnp.sqrt(var + EPS)
        y = y * params[f"g{i}"] + params[f"beta{i}"]
        h = jnp.maximum(y, 0.0)
    out = jnp.dot(h.astype(jnp.bfloat16), params["w4"],
                  preferred_element_type=jnp.float32) + params["b4"]
    return out[:, :10]


if __name__ == "__main__":
    key = jax.random.PRNGKey(0)
    kp, kx1, kx2 = jax.random.split(key, 3)
    params = init_params(kp)

    # Small batch -> single fused-block kernel (manual weight streaming).
    B1 = 8
    x1 = jax.random.normal(kx1, (B1, 1, 28, 28), jnp.float32)   # MNIST-shaped NCHW
    out1 = jax.block_until_ready(net_forward(x1, params, epoch=0))
    ref1 = reference_forward(x1, params)
    assert out1.shape == (B1, 10)
    err1 = float(jnp.max(jnp.abs(out1 - ref1)))
    assert jnp.allclose(out1, ref1, atol=1e-2, rtol=1e-2), f"fused max abs err {err1}"

    # Larger batch -> batch-tiled grid (two-pass BN via per-tile stats, parallel axis).
    B2 = 512
    x2 = jax.random.normal(kx2, (B2, 1, 28, 28), jnp.float32)
    out2 = jax.block_until_ready(net_forward(x2, params, epoch=0))
    ref2 = reference_forward(x2, params)
    assert out2.shape == (B2, 10)
    err2 = float(jnp.max(jnp.abs(out2 - ref2)))
    assert jnp.allclose(out2, ref2, atol=2e-2, rtol=2e-2), f"tiled max abs err {err2}"

    print("KERNEL_OK")
</pallas_src>

<mosaic_0001>
module attributes {stable_mosaic.version = 11 : i64} {
  func.func @_fused_kernel(%arg0: memref<8x784xf32, #tpu.memory_space<vmem>>, %arg1: memref<784x512xbf16, #tpu.memory_space<any>>, %arg2: memref<1x512xf32, #tpu.memory_space<vmem>>, %arg3: memref<1x512xf32, #tpu.memory_space<vmem>>, %arg4: memref<896x256xbf16, #tpu.memory_space<any>>, %arg5: memref<1x256xf32, #tpu.memory_space<vmem>>, %arg6: memref<1x256xf32, #tpu.memory_space<vmem>>, %arg7: memref<1x128xf32, #tpu.memory_space<vmem>>, %arg8: memref<1x128xf32, #tpu.memory_space<vmem>>, %arg9: memref<1x128xf32, #tpu.memory_space<vmem>>, %arg10: memref<8x128xf32, #tpu.memory_space<vmem>>, %arg11: memref<784x512xbf16, #tpu.memory_space<vmem>>, %arg12: memref<896x256xbf16, #tpu.memory_space<vmem>>, %arg13: memref<3x!tpu.dma_semaphore, #tpu.memory_space<semaphore_mem>>) attributes {dimension_semantics = [], scalar_prefetch = 0 : i64, scratch_operands = 3 : i64, tpu.core_type = #tpu.core_type<tc>} {
    %c0_i32 = arith.constant 0 : i32
    %c0_i32_0 = arith.constant 0 : i32
    %c0_i32_1 = arith.constant 0 : i32
    %0 = tpu.memref_slice %arg1[%c0_i32_0, %c0_i32_1] : memref<784x512xbf16, #tpu.memory_space<any>> -> memref<512x512xbf16, #tpu.memory_space<any>>
    %c0_i32_2 = arith.constant 0 : i32
    %c0_i32_3 = arith.constant 0 : i32
    %1 = tpu.memref_slice %arg11[%c0_i32_2, %c0_i32_3] : memref<784x512xbf16, #tpu.memory_space<vmem>> -> memref<512x512xbf16, #tpu.memory_space<vmem>>
    %2 = tpu.memref_slice %arg13[%c0_i32] : memref<3x!tpu.dma_semaphore, #tpu.memory_space<semaphore_mem>> -> memref<1x!tpu.dma_semaphore, #tpu.memory_space<semaphore_mem>>
    %3 = tpu.memref_squeeze %2 : memref<1x!tpu.dma_semaphore, #tpu.memory_space<semaphore_mem>> -> memref<!tpu.dma_semaphore, #tpu.memory_space<semaphore_mem>>
    tpu.enqueue_dma source(%0 : memref<512x512xbf16, #tpu.memory_space<any>>) target(%1 : memref<512x512xbf16, #tpu.memory_space<vmem>>) target_semaphore(%3 : memref<!tpu.dma_semaphore, #tpu.memory_space<semaphore_mem>>)
    %c1_i32 = arith.constant 1 : i32
    %c512_i32 = arith.constant 512 : i32
    %c0_i32_4 = arith.constant 0 : i32
    %4 = tpu.memref_slice %arg1[%c512_i32, %c0_i32_4] : memref<784x512xbf16, #tpu.memory_space<any>> -> memref<272x512xbf16, #tpu.memory_space<any>>
    %c512_i32_5 = arith.constant 512 : i32
    %c0_i32_6 = arith.constant 0 : i32
    %5 = tpu.memref_slice %arg11[%c512_i32_5, %c0_i32_6] : memref<784x512xbf16, #tpu.memory_space<vmem>> -> memref<272x512xbf16, #tpu.memory_space<vmem>>
    %6 = tpu.memref_slice %arg13[%c1_i32] : memref<3x!tpu.dma_semaphore, #tpu.memory_space<semaphore_mem>> -> memref<1x!tpu.dma_semaphore, #tpu.memory_space<semaphore_mem>>
    %7 = tpu.memref_squeeze %6 : memref<1x!tpu.dma_semaphore, #tpu.memory_space<semaphore_mem>> -> memref<!tpu.dma_semaphore, #tpu.memory_space<semaphore_mem>>
    tpu.enqueue_dma source(%4 : memref<272x512xbf16, #tpu.memory_space<any>>) target(%5 : memref<272x512xbf16, #tpu.memory_space<vmem>>) target_semaphore(%7 : memref<!tpu.dma_semaphore, #tpu.memory_space<semaphore_mem>>)
    %c2_i32 = arith.constant 2 : i32
    %8 = tpu.memref_slice %arg13[%c2_i32] : memref<3x!tpu.dma_semaphore, #tpu.memory_space<semaphore_mem>> -> memref<1x!tpu.dma_semaphore, #tpu.memory_space<semaphore_mem>>
    %9 = tpu.memref_squeeze %8 : memref<1x!tpu.dma_semaphore, #tpu.memory_space<semaphore_mem>> -> memref<!tpu.dma_semaphore, #tpu.memory_space<semaphore_mem>>
    tpu.enqueue_dma source(%arg4 : memref<896x256xbf16, #tpu.memory_space<any>>) target(%arg12 : memref<896x256xbf16, #tpu.memory_space<vmem>>) target_semaphore(%9 : memref<!tpu.dma_semaphore, #tpu.memory_space<semaphore_mem>>)
    %c0 = arith.constant 0 : index
    %c0_7 = arith.constant 0 : index
    %10 = vector.load %arg0[%c0, %c0_7] : memref<8x784xf32, #tpu.memory_space<vmem>>, vector<8x784xf32>
    %11 = arith.truncf %10 : vector<8x784xf32> to vector<8x784xbf16>
    %c0_i32_8 = arith.constant 0 : i32
    %c0_i32_9 = arith.constant 0 : i32
    %c0_i32_10 = arith.constant 0 : i32
    %12 = tpu.memref_slice %arg1[%c0_i32_9, %c0_i32_10] : memref<784x512xbf16, #tpu.memory_space<any>> -> memref<512x512xbf16, #tpu.memory_space<any>>
    %c0_i32_11 = arith.constant 0 : i32
    %c0_i32_12 = arith.constant 0 : i32
    %13 = tpu.memref_slice %arg11[%c0_i32_11, %c0_i32_12] : memref<784x512xbf16, #tpu.memory_space<vmem>> -> memref<512x512xbf16, #tpu.memory_space<vmem>>
    %14 = tpu.memref_slice %arg13[%c0_i32_8] : memref<3x!tpu.dma_semaphore, #tpu.memory_space<semaphore_mem>> -> memref<1x!tpu.dma_semaphore, #tpu.memory_space<semaphore_mem>>
    %15 = tpu.memref_squeeze %14 : memref<1x!tpu.dma_semaphore, #tpu.memory_space<semaphore_mem>> -> memref<!tpu.dma_semaphore, #tpu.memory_space<semaphore_mem>>
    tpu.wait_dma2 semaphore(%15 : memref<!tpu.dma_semaphore, #tpu.memory_space<semaphore_mem>>) src(%12 : memref<512x512xbf16, #tpu.memory_space<any>>) dst(%13 : memref<512x512xbf16, #tpu.memory_space<vmem>>)
    %16 = vector.extract_strided_slice %11 {offsets = [0, 0], sizes = [8, 512], strides = [1, 1]} : vector<8x784xbf16> to vector<8x512xbf16>
    %c0_13 = arith.constant 0 : index
    %c0_14 = arith.constant 0 : index
    %17 = vector.load %arg11[%c0_13, %c0_14] : memref<784x512xbf16, #tpu.memory_space<vmem>>, vector<512x512xbf16>
    %cst = arith.constant dense<0.000000e+00> : vector<8x512xf32>
    %18 = tpu.matmul %16, %17, %cst {dimension_numbers = #tpu.dot_dimension_numbers<[1], [0], [0], [1], [0, 0, 1, 1], [], []>} : vector<8x512xbf16>, vector<512x512xbf16>, vector<8x512xf32> -> vector<8x512xf32>
    %c1_i32_15 = arith.constant 1 : i32
    %c512_i32_16 = arith.constant 512 : i32
    %c0_i32_17 = arith.constant 0 : i32
    %19 = tpu.memref_slice %arg1[%c512_i32_16, %c0_i32_17] : memref<784x512xbf16, #tpu.memory_space<any>> -> memref<272x512xbf16, #tpu.memory_space<any>>
    %c512_i32_18 = arith.constant 512 : i32
    %c0_i32_19 = arith.constant 0 : i32
    %20 = tpu.memref_slice %arg11[%c512_i32_18, %c0_i32_19] : memref<784x512xbf16, #tpu.memory_space<vmem>> -> memref<272x512xbf16, #tpu.memory_space<vmem>>
    %21 = tpu.memref_slice %arg13[%c1_i32_15] : memref<3x!tpu.dma_semaphore, #tpu.memory_space<semaphore_mem>> -> memref<1x!tpu.dma_semaphore, #tpu.memory_space<semaphore_mem>>
    %22 = tpu.memref_squeeze %21 : memref<1x!tpu.dma_semaphore, #tpu.memory_space<semaphore_mem>> -> memref<!tpu.dma_semaphore, #tpu.memory_space<semaphore_mem>>
    tpu.wait_dma2 semaphore(%22 : memref<!tpu.dma_semaphore, #tpu.memory_space<semaphore_mem>>) src(%19 : memref<272x512xbf16, #tpu.memory_space<any>>) dst(%20 : memref<272x512xbf16, #tpu.memory_space<vmem>>)
    %23 = vector.extract_strided_slice %11 {offsets = [0, 512], sizes = [8, 272], strides = [1, 1]} : vector<8x784xbf16> to vector<8x272xbf16>
    %c512 = arith.constant 512 : index
    %c0_20 = arith.constant 0 : index
    %24 = vector.load %arg11[%c512, %c0_20] : memref<784x512xbf16, #tpu.memory_space<vmem>>, vector<272x512xbf16>
    %cst_21 = arith.constant dense<0.000000e+00> : vector<8x512xf32>
    %25 = tpu.matmul %23, %24, %cst_21 {dimension_numbers = #tpu.dot_dimension_numbers<[1], [0], [0], [1], [0, 0, 1, 1], [], []>} : vector<8x272xbf16>, vector<272x512xbf16>, vector<8x512xf32> -> vector<8x512xf32>
    %26 = arith.addf %18, %25 : vector<8x512xf32>
    %cst_22 = arith.constant dense<0.000000e+00> : vector<512xf32>
    %27 = vector.multi_reduction <add>, %26, %cst_22 [0] : vector<8x512xf32> to vector<512xf32>
    %28 = vector.shape_cast %27 : vector<512xf32> to vector<1x512xf32>
    %cst_23 = arith.constant 8.000000e+00 : f32
    %29 = vector.broadcast %cst_23 : f32 to vector<1x512xf32>
    %30 = arith.divf %28, %29 : vector<1x512xf32>
    %31 = vector.broadcast %30 : vector<1x512xf32> to vector<8x512xf32>
    %32 = arith.subf %26, %31 : vector<8x512xf32>
    %33 = arith.mulf %32, %32 : vector<8x512xf32>
    %cst_24 = arith.constant dense<0.000000e+00> : vector<512xf32>
    %34 = vector.multi_reduction <add>, %33, %cst_24 [0] : vector<8x512xf32> to vector<512xf32>
    %35 = vector.shape_cast %34 : vector<512xf32> to vector<1x512xf32>
    %cst_25 = arith.constant 8.000000e+00 : f32
    %36 = vector.broadcast %cst_25 : f32 to vector<1x512xf32>
    %37 = arith.divf %35, %36 : vector<1x512xf32>
    %c0_26 = arith.constant 0 : index
    %c0_27 = arith.constant 0 : index
    %38 = vector.load %arg2[%c0_26, %c0_27] : memref<1x512xf32, #tpu.memory_space<vmem>>, vector<1x512xf32>
    %cst_28 = arith.constant 9.99999974E-6 : f32
    %39 = vector.broadcast %cst_28 : f32 to vector<1x512xf32>
    %40 = arith.addf %37, %39 : vector<1x512xf32>
    %41 = math.rsqrt %40 : vector<1x512xf32>
    %42 = arith.mulf %38, %41 : vector<1x512xf32>
    %c0_29 = arith.constant 0 : index
    %c0_30 = arith.constant 0 : index
    %43 = vector.load %arg3[%c0_29, %c0_30] : memref<1x512xf32, #tpu.memory_space<vmem>>, vector<1x512xf32>
    %44 = arith.mulf %30, %42 : vector<1x512xf32>
    %45 = arith.subf %43, %44 : vector<1x512xf32>
    %46 = vector.broadcast %42 : vector<1x512xf32> to vector<8x512xf32>
    %47 = arith.mulf %26, %46 : vector<8x512xf32>
    %48 = vector.broadcast %45 : vector<1x512xf32> to vector<8x512xf32>
    %49 = arith.addf %47, %48 : vector<8x512xf32>
    %cst_31 = arith.constant 0.000000e+00 : f32
    %50 = vector.broadcast %cst_31 : f32 to vector<8x512xf32>
    %51 = arith.maximumf %49, %50 : vector<8x512xf32>
    %c2_i32_32 = arith.constant 2 : i32
    %52 = tpu.memref_slice %arg13[%c2_i32_32] : memref<3x!tpu.dma_semaphore, #tpu.memory_space<semaphore_mem>> -> memref<1x!tpu.dma_semaphore, #tpu.memory_space<semaphore_mem>>
    %53 = tpu.memref_squeeze %52 : memref<1x!tpu.dma_semaphore, #tpu.memory_space<semaphore_mem>> -> memref<!tpu.dma_semaphore, #tpu.memory_space<semaphore_mem>>
    tpu.wait_dma2 semaphore(%53 : memref<!tpu.dma_semaphore, #tpu.memory_space<semaphore_mem>>) src(%arg4 : memref<896x256xbf16, #tpu.memory_space<any>>) dst(%arg12 : memref<896x256xbf16, #tpu.memory_space<vmem>>)
    %54 = arith.truncf %51 : vector<8x512xf32> to vector<8x512xbf16>
    %c0_33 = arith.constant 0 : index
    %c0_34 = arith.constant 0 : index
    %55 = vector.load %arg12[%c0_33, %c0_34] : memref<896x256xbf16, #tpu.memory_space<vmem>>, vector<512x256xbf16>
    %cst_35 = arith.constant dense<0.000000e+00> : vector<8x256xf32>
    %56 = tpu.matmul %54, %55, %cst_35 {dimension_numbers = #tpu.dot_dimension_numbers<[1], [0], [0], [1], [0, 0, 1, 1], [], []>} : vector<8x512xbf16>, vector<512x256xbf16>, vector<8x256xf32> -> vector<8x256xf32>
    %cst_36 = arith.constant dense<0.000000e+00> : vector<256xf32>
    %57 = vector.multi_reduction <add>, %56, %cst_36 [0] : vector<8x256xf32> to vector<256xf32>
    %58 = vector.shape_cast %57 : vector<256xf32> to vector<1x256xf32>
    %cst_37 = arith.constant 8.000000e+00 : f32
    %59 = vector.broadcast %cst_37 : f32 to vector<1x256xf32>
    %60 = arith.divf %58, %59 : vector<1x256xf32>
    %61 = vector.broadcast %60 : vector<1x256xf32> to vector<8x256xf32>
    %62 = arith.subf %56, %61 : vector<8x256xf32>
    %63 = arith.mulf %62, %62 : vector<8x256xf32>
    %cst_38 = arith.constant dense<0.000000e+00> : vector<256xf32>
    %64 = vector.multi_reduction <add>, %63, %cst_38 [0] : vector<8x256xf32> to vector<256xf32>
    %65 = vector.shape_cast %64 : vector<256xf32> to vector<1x256xf32>
    %cst_39 = arith.constant 8.000000e+00 : f32
    %66 = vector.broadcast %cst_39 : f32 to vector<1x256xf32>
    %67 = arith.divf %65, %66 : vector<1x256xf32>
    %c0_40 = arith.constant 0 : index
    %c0_41 = arith.constant 0 : index
    %68 = vector.load %arg5[%c0_40, %c0_41] : memref<1x256xf32, #tpu.memory_space<vmem>>, vector<1x256xf32>
    %cst_42 = arith.constant 9.99999974E-6 : f32
    %69 = vector.broadcast %cst_42 : f32 to vector<1x256xf32>
    %70 = arith.addf %67, %69 : vector<1x256xf32>
    %71 = math.rsqrt %70 : vector<1x256xf32>
    %72 = arith.mulf %68, %71 : vector<1x256xf32>
    %c0_43 = arith.constant 0 : index
    %c0_44 = arith.constant 0 : index
    %73 = vector.load %arg6[%c0_43, %c0_44] : memref<1x256xf32, #tpu.memory_space<vmem>>, vector<1x256xf32>
    %74 = arith.mulf %60, %72 : vector<1x256xf32>
    %75 = arith.subf %73, %74 : vector<1x256xf32>
    %76 = vector.broadcast %72 : vector<1x256xf32> to vector<8x256xf32>
    %77 = arith.mulf %56, %76 : vector<8x256xf32>
    %78 = vector.broadcast %75 : vector<1x256xf32> to vector<8x256xf32>
    %79 = arith.addf %77, %78 : vector<8x256xf32>
    %cst_45 = arith.constant 0.000000e+00 : f32
    %80 = vector.broadcast %cst_45 : f32 to vector<8x256xf32>
    %81 = arith.maximumf %79, %80 : vector<8x256xf32>
    %82 = arith.truncf %81 : vector<8x256xf32> to vector<8x256xbf16>
    %c512_46 = arith.constant 512 : index
    %c0_47 = arith.constant 0 : index
    %83 = vector.load %arg12[%c512_46, %c0_47] : memref<896x256xbf16, #tpu.memory_space<vmem>>, vector<256x128xbf16>
    %cst_48 = arith.constant dense<0.000000e+00> : vector<8x128xf32>
    %84 = tpu.matmul %82, %83, %cst_48 {dimension_numbers = #tpu.dot_dimension_numbers<[1], [0], [0], [1], [0, 0, 1, 1], [], []>} : vector<8x256xbf16>, vector<256x128xbf16>, vector<8x128xf32> -> vector<8x128xf32>
    %cst_49 = arith.constant dense<0.000000e+00> : vector<128xf32>
    %85 = vector.multi_reduction <add>, %84, %cst_49 [0] : vector<8x128xf32> to vector<128xf32>
    %86 = vector.shape_cast %85 : vector<128xf32> to vector<1x128xf32>
    %cst_50 = arith.constant 8.000000e+00 : f32
    %87 = vector.broadcast %cst_50 : f32 to vector<1x128xf32>
    %88 = arith.divf %86, %87 : vector<1x128xf32>
    %89 = vector.broadcast %88 : vector<1x128xf32> to vector<8x128xf32>
    %90 = arith.subf %84, %89 : vector<8x128xf32>
    %91 = arith.mulf %90, %90 : vector<8x128xf32>
    %cst_51 = arith.constant dense<0.000000e+00> : vector<128xf32>
    %92 = vector.multi_reduction <add>, %91, %cst_51 [0] : vector<8x128xf32> to vector<128xf32>
    %93 = vector.shape_cast %92 : vector<128xf32> to vector<1x128xf32>
    %cst_52 = arith.constant 8.000000e+00 : f32
    %94 = vector.broadcast %cst_52 : f32 to vector<1x128xf32>
    %95 = arith.divf %93, %94 : vector<1x128xf32>
    %c0_53 = arith.constant 0 : index
    %c0_54 = arith.constant 0 : index
    %96 = vector.load %arg7[%c0_53, %c0_54] : memref<1x128xf32, #tpu.memory_space<vmem>>, vector<1x128xf32>
    %cst_55 = arith.constant 9.99999974E-6 : f32
    %97 = vector.broadcast %cst_55 : f32 to vector<1x128xf32>
    %98 = arith.addf %95, %97 : vector<1x128xf32>
    %99 = math.rsqrt %98 : vector<1x128xf32>
    %100 = arith.mulf %96, %99 : vector<1x128xf32>
    %c0_56 = arith.constant 0 : index
    %c0_57 = arith.constant 0 : index
    %101 = vector.load %arg8[%c0_56, %c0_57] : memref<1x128xf32, #tpu.memory_space<vmem>>, vector<1x128xf32>
    %102 = arith.mulf %88, %100 : vector<1x128xf32>
    %103 = arith.subf %101, %102 : vector<1x128xf32>
    %104 = vector.broadcast %100 : vector<1x128xf32> to vector<8x128xf32>
    %105 = arith.mulf %84, %104 : vector<8x128xf32>
    %106 = vector.broadcast %103 : vector<1x128xf32> to vector<8x128xf32>
    %107 = arith.addf %105, %106 : vector<8x128xf32>
    %cst_58 = arith.constant 0.000000e+00 : f32
    %108 = vector.broadcast %cst_58 : f32 to vector<8x128xf32>
    %109 = arith.maximumf %107, %108 : vector<8x128xf32>
    %110 = arith.truncf %109 : vector<8x128xf32> to vector<8x128xbf16>
    %c768 = arith.constant 768 : index
    %c0_59 = arith.constant 0 : index
    %111 = vector.load %arg12[%c768, %c0_59] : memref<896x256xbf16, #tpu.memory_space<vmem>>, vector<128x128xbf16>
    %cst_60 = arith.constant dense<0.000000e+00> : vector<8x128xf32>
    %112 = tpu.matmul %110, %111, %cst_60 {dimension_numbers = #tpu.dot_dimension_numbers<[1], [0], [0], [1], [0, 0, 1, 1], [], []>} : vector<8x128xbf16>, vector<128x128xbf16>, vector<8x128xf32> -> vector<8x128xf32>
    %c0_61 = arith.constant 0 : index
    %c0_62 = arith.constant 0 : index
    %113 = vector.load %arg9[%c0_61, %c0_62] : memref<1x128xf32, #tpu.memory_space<vmem>>, vector<1x128xf32>
    %114 = vector.broadcast %113 : vector<1x128xf32> to vector<8x128xf32>
    %115 = arith.addf %112, %114 : vector<8x128xf32>
    %c0_63 = arith.constant 0 : index
    %c0_64 = arith.constant 0 : index
    %116 = vector.load %arg10[%c0_63, %c0_64] : memref<8x128xf32, #tpu.memory_space<vmem>>, vector<8x128xf32>
    tpu.vector_store %arg10[%c0_63, %c0_64], %115 {strides = array<i32>} : memref<8x128xf32, #tpu.memory_space<vmem>>, vector<8x128xf32>,
    return
  }
}

</mosaic_0001>

<bundles_post_ra>
// kernel: tpu_custom_call.1
= control target key start
LH: loop header
LB: loop body
LE: loop exit
PB: predicated region body
PF: predicated region fallthrough
CT: control target
= control target key end

     0   :  { %15 = vsyncpa [#allocation6], 0  ;;  %s2165_s0 = inlined_call_operand.hbm [shape: f32[8,784], index: 0, kind: input, shape index: {}]   ;;  %s2166_s1 = inlined_call_operand.hbm [shape: bf16[784,512], index: 1, kind: input, shape index: {}]   ;;  %s2167_s2 = inlined_call_operand.vmem [shape: f32[1,512], index: 2, kind: input, shape index: {}]   ;;  %s2168_s3 = inlined_call_operand.vmem [shape: f32[1,512], index: 3, kind: input, shape index: {}]   ;;  %s2169_s4 = inlined_call_operand.hbm [shape: bf16[896,256], index: 4, kind: input, shape index: {}]   ;;  %s2170_s5 = inlined_call_operand.vmem [shape: f32[1,256], index: 5, kind: input, shape index: {}]   ;;  %s2171_s6 = inlined_call_operand.vmem [shape: f32[1,256], index: 6, kind: input, shape index: {}]   ;;  %s2172_s7 = inlined_call_operand.vmem [shape: f32[1,128], index: 7, kind: input, shape index: {}]   ;;  %s2173_s8 = inlined_call_operand.vmem [shape: f32[1,128], index: 8, kind: input, shape index: {}]   ;;  %s2174_s9 = inlined_call_operand.vmem [shape: f32[1,128], index: 9, kind: input, shape index: {}]   ;;  %s2175_s10 = inlined_call_operand.hbm [shape: f32[8,128], index: 10, kind: output, shape index: {}]  }
   0x1   :  { %16 = vsyncpa [#allocation7], 0  ;;  %s1519_s13 = smov [#allocation5]   ;;  %s1465_s17 = scalar_lea.hbm %s2165_s0, 896 }
   0x2   :  { %s23_s14 = sshll.u32 %s1519_s13, 4  ;;  %p1466_p0 = scmp.ne.s32.totalorder %s2165_s0, %s1465_s17  ;;  %s24_s14 = int_to_ptr.vmem [resolvable:$true] %s23_s14 }
   0x3   :  { %p1469_p1 = scmp.lt.u32.totalorder %s1465_s17, %s2165_s0 }
   0x5   :  { %p1471_p2 = pnand %p1469_p1, %p1466_p0 }
   0x7   :  { %1474 = shalt.err (!%p1471_p2)
}
   0x8   :  { %s1475_s22 = scalar_lea.vmem %s24_s14, 896  ;;  %p1480_p4 = scmp.lt.s32.totalorder %s24_s14, %s24_s14 }
   0x9   :  { %p1476_p3 = scmp.ne.s32.totalorder %s24_s14, %s1475_s22  ;;  %p1481_p5 = scmp.lt.s32.totalorder %s1475_s22, %s1475_s22 }
   0xb   :  { %p1482_p6 = por %p1481_p5, %p1480_p4 }
   0xd   :  { %p1483_p7 = pnand %p1482_p6, %p1476_p3 }
   0xf   :  { %1486 = shalt.err (!%p1483_p7)
}
  0x10   :  { %26 = dma.hbm_to_vmem [thread:$0]  %s2165_s0, 896, %s24_s14, [#allocation6]  }
  0x11   :  { %1509 = dma.done.wait [#allocation6], 896  }
  0x12   :  { %1510 = vsyncadd [#allocation6], 4294966400  ;;  %s49_s25 = sld [smem:[#allocation0]]   ;;  %s1520_s26 = smov 4  }
  0x13   :  { %65 = sst [smem:[#allocation10 + $0x2]] %s1520_s26  ;;  %s1521_s27 = smov 64  }
  0x14   :  { %67 = sst [smem:[#allocation10 + $0x3]] %s1521_s27  ;;  %s1522_s28 = smov [#allocation2]  }
  0x15   :  { %75 = sst [smem:[#allocation10 + $0x7]] %s1521_s27  ;;  %s57_s29 = sshll.u32 %s1522_s28, 4  ;;  %s58_s29 = int_to_ptr.vmem [resolvable:$true] %s57_s29 }
  0x16   :  { %77 = sst [smem:[#allocation10 + $0x8]] %s1520_s26  ;;  %s1523_s30 = smov 512  }
  0x17   :  { %61 = sst [smem:[#allocation10]] %s1523_s30  ;;  %s1524_s12 = smov 128  }
  0x18   :  { %s1343_s11 = sshll.u32 %s49_s25, 26  ;;  %63 = sst [smem:[#allocation10 + $0x1]] %s1523_s30 }
  0x19   :  { %s1611_s0 = sadd.s32 134217728, %s1343_s11  ;;  %69 = sst [smem:[#allocation10 + $0x4]] %s1524_s12 }
  0x1a   :  { %s1525_s13 = smov 2   ;;  %s1526_s14 = smov 256  }
  0x1b   :  { %71 = sst [smem:[#allocation10 + $0x5]] %s1525_s13  ;;  %s1527_s15 = smov [#allocation4]  }
  0x1c   :  { %73 = sst [smem:[#allocation10 + $0x6]] %s1526_s14  ;;  %s1528_s16 = smov [#allocation9]  }
  0x1d   :  { %79 = dma.general %s2166_s1, 16384, %s58_s29, %s1527_s15, %s1528_s16, [#allocation10], %s1611_s0, 0  }
  0x1e   :  { %98 = sst [smem:[#allocation12]] %s1523_s30  ;;  %s1529_s19 = smov [#allocation2 + $0x400]  }
  0x1f   :  { %100 = sst [smem:[#allocation12 + $0x1]] %s1523_s30  ;;  %s94_s20 = sshll.u32 %s1529_s19, 4  ;;  %s95_s20 = int_to_ptr.vmem [resolvable:$true] %s94_s20 }
  0x20   :  { %102 = sst [smem:[#allocation12 + $0x2]] %s1520_s26  ;;  %s80_s23 = scalar_lea.hbm %s2166_s1, 16384 }
  0x21   :  { %104 = sst [smem:[#allocation12 + $0x3]] %s1521_s27  ;;  %s1530_s24 = smov [#allocation4 + $0x1]  }
  0x22   :  { %106 = sst [smem:[#allocation12 + $0x4]] %s1524_s12  ;;  %s1531_s25 = smov [#allocation11]  }
  0x23   :  { %108 = sst [smem:[#allocation12 + $0x5]] %s1525_s13  ;;  %s1532_s28 = smov [#allocation3]  }
  0x24   :  { %110 = sst [smem:[#allocation12 + $0x6]] %s1526_s14  ;;  %s129_s29 = sshll.u32 %s1532_s28, 4  ;;  %s130_s29 = int_to_ptr.vmem [resolvable:$true] %s129_s29 }
  0x25   :  { %112 = sst [smem:[#allocation12 + $0x7]] %s1521_s27  ;;  %s1533_s1 = smov [#allocation4 + $0x2]  }
  0x26   :  { %114 = sst [smem:[#allocation12 + $0x8]] %s1520_s26  ;;  %s1534_s30 = smov [#allocation13]  }
  0x27   :  { %116 = dma.general %s80_s23, 8704, %s95_s20, %s1530_s24, %s1531_s25, [#allocation12], %s1611_s0, 0  }
  0x28   :  { %133 = sst [smem:[#allocation14]] %s1526_s14 }
  0x29   :  { %135 = sst [smem:[#allocation14 + $0x1]] %s1526_s14 }
  0x2a   :  { %137 = sst [smem:[#allocation14 + $0x2]] %s1525_s13 }
  0x2b   :  { %139 = sst [smem:[#allocation14 + $0x3]] %s1521_s27 }
  0x2c   :  { %141 = sst [smem:[#allocation14 + $0x4]] %s1524_s12 }
  0x2d   :  { %143 = sst [smem:[#allocation14 + $0x5]] %s1525_s13 }
  0x2e   :  { %145 = sst [smem:[#allocation14 + $0x6]] %s1524_s12 }
  0x2f   :  { %147 = sst [smem:[#allocation14 + $0x7]] %s1521_s27 }
  0x30   :  { %149 = sst [smem:[#allocation14 + $0x8]] %s1520_s26 }
  0x31   :  { %151 = dma.general %s2169_s4, 14336, %s130_s29, %s1533_s1, %s1534_s30, [#allocation14], %s1611_s0, 0  }
  0x32   :  { %v152_v0 = vld [vmem:[#allocation5] sm:$0xff]  ;;  %v153_v1 = vld [vmem:[#allocation5 + $0x8] sm:$0xff]  ;;  %v154_v2 = vld [vmem:[#allocation5 + $0x10] sm:$0xff] }
  0x33   :  { %v155_v3 = vld [vmem:[#allocation5 + $0x18] sm:$0xff]  ;;  %v156_v4 = vld [vmem:[#allocation5 + $0x20] sm:$0xff]  ;;  %v157_v5 = vld [vmem:[#allocation5 + $0x28] sm:$0xff]  ;;  %v1640_v6 = vpack.c.bf16 %v152_v0, %v152_v0  ;;  %v1642_v7 = vpack.c.bf16 %v153_v1, %v153_v1  ;;  %v1644_v8 = vpack.c.bf16 %v154_v2, %v154_v2 }
  0x34   :  { %v158_v9 = vld [vmem:[#allocation5 + $0x30] sm:$0xff]  ;;  %v1646_v10 = vpack.c.bf16 %v155_v3, %v155_v3  ;;  %v1648_v11 = vpack.c.bf16 %v156_v4, %v156_v4  ;;  %v1650_v12 = vpack.c.bf16 %v157_v5, %v157_v5 }
  0x35   :  { %2180 = vst [vmem:[#allocation20_spill] sm:$0xff] %v1640_v6  ;;  %2181 = vst [vmem:[#allocation21_spill] sm:$0xff] %v1644_v8  ;;  %v1652_v13 = vpack.c.bf16 %v158_v9, %v158_v9 }
  0x36   :  { %2182 = vst [vmem:[#allocation22_spill] sm:$0xff] %v1646_v10 }
  0x37   :  { %1511 = dma.done.wait [#allocation4], 16384 }
  0x38   :  { %1512 = vsyncadd [#allocation4], 4294950912  ;;  %v1654_v14 = vld [vmem:[#allocation2] sm:$0xff]  ;;  %v1656_v15 = vld [vmem:[#allocation2 + $0x8] sm:$0xff] }
  0x39   :  { %v1658_v16 = vld [vmem:[#allocation2 + $0x10] sm:$0xff]  ;;  %v1660_v17 = vld [vmem:[#allocation2 + $0x18] sm:$0xff]  ;;  %v1662_v18 = vld [vmem:[#allocation2 + $0x20] sm:$0xff] }
  0x3a   :  { %v1664_v19 = vld [vmem:[#allocation2 + $0x28] sm:$0xff]  ;;  %v1666_v20 = vld [vmem:[#allocation2 + $0x30] sm:$0xff]  ;;  %v1668_v21 = vld [vmem:[#allocation2 + $0x38] sm:$0xff] }
  0x3b   :  { %v1670_v22 = vld [vmem:[#allocation2 + $0x40] sm:$0xff]  ;;  %v1672_v23 = vld [vmem:[#allocation2 + $0x48] sm:$0xff]  ;;  %v1674_v24 = vld [vmem:[#allocation2 + $0x50] sm:$0xff] }
  0x3c   :  { %v1676_v25 = vld [vmem:[#allocation2 + $0x58] sm:$0xff]  ;;  %v1678_v26 = vld [vmem:[#allocation2 + $0x60] sm:$0xff]  ;;  %v1680_v27 = vld [vmem:[#allocation2 + $0x68] sm:$0xff] }
  0x3d   :  { %v1682_v28 = vld [vmem:[#allocation2 + $0x70] sm:$0xff]  ;;  %v1684_v29 = vld [vmem:[#allocation2 + $0x78] sm:$0xff]  ;;  %v1686_v30 = vld [vmem:[#allocation2 + $0x80] sm:$0xff] }
  0x3e   :  { %v1688_v31 = vld [vmem:[#allocation2 + $0x88] sm:$0xff]  ;;  %v1690_v32 = vld [vmem:[#allocation2 + $0x90] sm:$0xff]  ;;  %v1692_v33 = vld [vmem:[#allocation2 + $0x98] sm:$0xff] }
  0x3f   :  { %v1694_v34 = vld [vmem:[#allocation2 + $0xa0] sm:$0xff]  ;;  %v1696_v35 = vld [vmem:[#allocation2 + $0xa8] sm:$0xff]  ;;  %v1698_v36 = vld [vmem:[#allocation2 + $0xb0] sm:$0xff] }
  0x40   :  { %v1700_v37 = vld [vmem:[#allocation2 + $0xb8] sm:$0xff]  ;;  %v1702_v38 = vld [vmem:[#allocation2 + $0xc0] sm:$0xff]  ;;  %v1704_v39 = vld [vmem:[#allocation2 + $0xc8] sm:$0xff] }
  0x41   :  { %v1706_v40 = vld [vmem:[#allocation2 + $0xd0] sm:$0xff]  ;;  %v1708_v41 = vld [vmem:[#allocation2 + $0xd8] sm:$0xff]  ;;  %v1710_v42 = vld [vmem:[#allocation2 + $0xe0] sm:$0xff] }
  0x42   :  { %v1712_v43 = vld [vmem:[#allocation2 + $0xe8] sm:$0xff]  ;;  %v1714_v44 = vld [vmem:[#allocation2 + $0xf0] sm:$0xff]  ;;  %v1716_v45 = vld [vmem:[#allocation2 + $0xf8] sm:$0xff] }
  0x43   :  { %v1718_v46 = vld [vmem:[#allocation2 + $0x100] sm:$0xff]  ;;  %v1720_v47 = vld [vmem:[#allocation2 + $0x108] sm:$0xff]  ;;  %v1722_v48 = vld [vmem:[#allocation2 + $0x110] sm:$0xff] }
  0x44   :  { %v1724_v49 = vld [vmem:[#allocation2 + $0x118] sm:$0xff]  ;;  %v1726_v50 = vld [vmem:[#allocation2 + $0x120] sm:$0xff]  ;;  %v1728_v51 = vld [vmem:[#allocation2 + $0x128] sm:$0xff] }
  0x45   :  { %v1730_v52 = vld [vmem:[#allocation2 + $0x130] sm:$0xff]  ;;  %v1732_v53 = vld [vmem:[#allocation2 + $0x138] sm:$0xff]  ;;  %v1734_v54 = vld [vmem:[#allocation2 + $0x140] sm:$0xff] }
  0x46   :  { %v1736_v55 = vld [vmem:[#allocation2 + $0x148] sm:$0xff]  ;;  %v1738_v56 = vld [vmem:[#allocation2 + $0x150] sm:$0xff]  ;;  %v1740_v57 = vld [vmem:[#allocation2 + $0x158] sm:$0xff] }
  0x47   :  { %2183 = vst [vmem:[#allocation23_spill] sm:$0xff] %v1738_v56  ;;  %2184 = vst [vmem:[#allocation24_spill] sm:$0xff] %v1740_v57  ;;  %v1742_v58 = vld [vmem:[#allocation2 + $0x160] sm:$0xff]  ;;  %v1744_v59 = vld [vmem:[#allocation2 + $0x168] sm:$0xff] }
  0x48   :  { %v1746_v60 = vld [vmem:[#allocation2 + $0x170] sm:$0xff]  ;;  %v1748_v61 = vld [vmem:[#allocation2 + $0x178] sm:$0xff]  ;;  %v1750_v62 = vld [vmem:[#allocation2 + $0x180] sm:$0xff] }
  0x49   :  { %2185 = vst [vmem:[#allocation25_spill] sm:$0xff] %v1746_v60  ;;  %2186 = vst [vmem:[#allocation26_spill] sm:$0xff] %v1748_v61  ;;  %v1752_v63 = vld [vmem:[#allocation2 + $0x188] sm:$0xff]  ;;  %v1754_v0 = vld [vmem:[#allocation2 + $0x190] sm:$0xff] }
  0x4a   :  { %2187 = vst [vmem:[#allocation27_spill] sm:$0xff] %v1754_v0  ;;  %v1756_v1 = vld [vmem:[#allocation2 + $0x198] sm:$0xff]  ;;  %v1758_v2 = vld [vmem:[#allocation2 + $0x1a0] sm:$0xff]  ;;  %v1760_v3 = vld [vmem:[#allocation2 + $0x1a8] sm:$0xff] }
  0x4b   :  { %2188 = vst [vmem:[#allocation28_spill] sm:$0xff] %v1756_v1  ;;  %v1762_v4 = vld [vmem:[#allocation2 + $0x1b0] sm:$0xff]  ;;  %v1764_v5 = vld [vmem:[#allocation2 + $0x1b8] sm:$0xff]  ;;  %v1766_v9 = vld [vmem:[#allocation2 + $0x1c0] sm:$0xff] }
  0x4c   :  { %2189 = vst [vmem:[#allocation29_spill] sm:$0xff] %v1762_v4  ;;  %2190 = vst [vmem:[#allocation30_spill] sm:$0xff] %v1764_v5  ;;  %v1768_v8 = vld [vmem:[#allocation2 + $0x1c8] sm:$0xff]  ;;  %v1770_v10 = vld [vmem:[#allocation2 + $0x1d0] sm:$0xff] }
  0x4d   :  { %2191 = vst [vmem:[#allocation31_spill] sm:$0xff] %v1766_v9  ;;  %2192 = vst [vmem:[#allocation32_spill] sm:$0xff] %v1768_v8  ;;  %v1772_v6 = vld [vmem:[#allocation2 + $0x1d8] sm:$0xff]  ;;  %v1774_v60 = vld [vmem:[#allocation2 + $0x1e0] sm:$0xff] }
  0x4e   :  { %2193 = vst [vmem:[#allocation33_spill] sm:$0xff] %v1770_v10  ;;  %2194 = vst [vmem:[#allocation34_spill] sm:$0xff] %v1772_v6  ;;  %v1776_v0 = vld [vmem:[#allocation2 + $0x1e8] sm:$0xff]  ;;  %v1778_v1 = vld [vmem:[#allocation2 + $0x1f0] sm:$0xff] }
  0x4f   :  { %2195 = vst [vmem:[#allocation35_spill] sm:$0xff] %v1774_v60  ;;  %2196 = vst [vmem:[#allocation36_spill] sm:$0xff] %v1776_v0  ;;  %v1780_v61 = vld [vmem:[#allocation2 + $0x1f8] sm:$0xff]  ;;  %v1782_v56 = vld [vmem:[#allocation2 + $0x200] sm:$0xff] }
  0x50   :  { %2197 = vst [vmem:[#allocation37_spill] sm:$0xff] %v1778_v1  ;;  %2198 = vst [vmem:[#allocation38_spill] sm:$0xff] %v1780_v61  ;;  %v1784_v4 = vld [vmem:[#allocation2 + $0x208] sm:$0xff]  ;;  %v1786_v5 = vld [vmem:[#allocation2 + $0x210] sm:$0xff] }
  0x51   :  { %2199 = vst [vmem:[#allocation39_spill] sm:$0xff] %v1782_v56  ;;  %2200 = vst [vmem:[#allocation40_spill] sm:$0xff] %v1784_v4  ;;  %v1788_v9 = vld [vmem:[#allocation2 + $0x218] sm:$0xff]  ;;  %v1790_v8 = vld [vmem:[#allocation2 + $0x220] sm:$0xff] }
  0x52   :  { %2201 = vst [vmem:[#allocation41_spill] sm:$0xff] %v1786_v5  ;;  %2202 = vst [vmem:[#allocation42_spill] sm:$0xff] %v1788_v9  ;;  %v1792_v10 = vld [vmem:[#allocation2 + $0x228] sm:$0xff]  ;;  %v1794_v6 = vld [vmem:[#allocation2 + $0x230] sm:$0xff] }
  0x53   :  { %2203 = vst [vmem:[#allocation43_spill] sm:$0xff] %v1790_v8  ;;  %2204 = vst [vmem:[#allocation44_spill] sm:$0xff] %v1792_v10  ;;  %v1796_v60 = vld [vmem:[#allocation2 + $0x238] sm:$0xff]  ;;  %v1798_v0 = vld [vmem:[#allocation2 + $0x240] sm:$0xff] }
  0x54   :  { %2205 = vst [vmem:[#allocation45_spill] sm:$0xff] %v1794_v6  ;;  %2206 = vst [vmem:[#allocation46_spill] sm:$0xff] %v1796_v60  ;;  %v1800_v1 = vld [vmem:[#allocation2 + $0x248] sm:$0xff]  ;;  %v1802_v61 = vld [vmem:[#allocation2 + $0x250] sm:$0xff] }
  0x55   :  { %2207 = vst [vmem:[#allocation47_spill] sm:$0xff] %v1798_v0  ;;  %2208 = vst [vmem:[#allocation48_spill] sm:$0xff] %v1800_v1  ;;  %v1804_v56 = vld [vmem:[#allocation2 + $0x258] sm:$0xff]  ;;  %v1806_v4 = vld [vmem:[#allocation2 + $0x260] sm:$0xff] }
  0x56   :  { %2209 = vst [vmem:[#allocation49_spill] sm:$0xff] %v1802_v61  ;;  %2210 = vst [vmem:[#allocation50_spill] sm:$0xff] %v1804_v56  ;;  %v1808_v5 = vld [vmem:[#allocation2 + $0x268] sm:$0xff]  ;;  %v1810_v9 = vld [vmem:[#allocation2 + $0x270] sm:$0xff] }
  0x57   :  { %2211 = vst [vmem:[#allocation51_spill] sm:$0xff] %v1806_v4  ;;  %2212 = vst [vmem:[#allocation52_spill] sm:$0xff] %v1808_v5  ;;  %v1812_v8 = vld [vmem:[#allocation2 + $0x278] sm:$0xff]  ;;  %v1814_v10 = vld [vmem:[#allocation2 + $0x280] sm:$0xff] }
  0x58   :  { %2213 = vst [vmem:[#allocation53_spill] sm:$0xff] %v1810_v9  ;;  %2214 = vst [vmem:[#allocation54_spill] sm:$0xff] %v1812_v8  ;;  %v1816_v6 = vld [vmem:[#allocation2 + $0x288] sm:$0xff]  ;;  %v1818_v60 = vld [vmem:[#allocation2 + $0x290] sm:$0xff] }
  0x59   :  { %2215 = vst [vmem:[#allocation55_spill] sm:$0xff] %v1814_v10  ;;  %2216 = vst [vmem:[#allocation56_spill] sm:$0xff] %v1816_v6  ;;  %v1820_v0 = vld [vmem:[#allocation2 + $0x298] sm:$0xff]  ;;  %v1822_v1 = vld [vmem:[#allocation2 + $0x2a0] sm:$0xff] }
  0x5a   :  { %2217 = vst [vmem:[#allocation57_spill] sm:$0xff] %v1818_v60  ;;  %2218 = vst [vmem:[#allocation58_spill] sm:$0xff] %v1820_v0  ;;  %v1824_v61 = vld [vmem:[#allocation2 + $0x2a8] sm:$0xff]  ;;  %v1826_v56 = vld [vmem:[#allocation2 + $0x2b0] sm:$0xff] }
  0x5b   :  { %2219 = vst [vmem:[#allocation59_spill] sm:$0xff] %v1822_v1  ;;  %2220 = vst [vmem:[#allocation60_spill] sm:$0xff] %v1824_v61  ;;  %v1828_v4 = vld [vmem:[#allocation2 + $0x2b8] sm:$0xff]  ;;  %v1830_v5 = vld [vmem:[#allocation2 + $0x2c0] sm:$0xff] }
  0x5c   :  { %2221 = vst [vmem:[#allocation61_spill] sm:$0xff] %v1826_v56  ;;  %2222 = vst [vmem:[#allocation62_spill] sm:$0xff] %v1828_v4  ;;  %v1832_v9 = vld [vmem:[#allocation2 + $0x2c8] sm:$0xff]  ;;  %v1834_v8 = vld [vmem:[#allocation2 + $0x2d0] sm:$0xff] }
  0x5d   :  { %2223 = vst [vmem:[#allocation63_spill] sm:$0xff] %v1830_v5  ;;  %2224 = vst [vmem:[#allocation64_spill] sm:$0xff] %v1832_v9  ;;  %v1836_v10 = vld [vmem:[#allocation2 + $0x2d8] sm:$0xff]  ;;  %v1838_v6 = vld [vmem:[#allocation2 + $0x2e0] sm:$0xff] }
  0x5e   :  { %2225 = vst [vmem:[#allocation65_spill] sm:$0xff] %v1834_v8  ;;  %2226 = vst [vmem:[#allocation66_spill] sm:$0xff] %v1836_v10  ;;  %v1840_v60 = vld [vmem:[#allocation2 + $0x2e8] sm:$0xff]  ;;  %v1842_v0 = vld [vmem:[#allocation2 + $0x2f0] sm:$0xff] }
  0x5f   :  { %2227 = vst [vmem:[#allocation67_spill] sm:$0xff] %v1838_v6  ;;  %2228 = vst [vmem:[#allocation68_spill] sm:$0xff] %v1840_v60  ;;  %v1844_v1 = vld [vmem:[#allocation2 + $0x2f8] sm:$0xff]  ;;  %v1846_v61 = vld [vmem:[#allocation2 + $0x300] sm:$0xff] }
  0x60   :  { %2229 = vst [vmem:[#allocation69_spill] sm:$0xff] %v1842_v0  ;;  %2230 = vst [vmem:[#allocation70_spill] sm:$0xff] %v1844_v1  ;;  %v1848_v56 = vld [vmem:[#allocation2 + $0x308] sm:$0xff]  ;;  %v1850_v4 = vld [vmem:[#allocation2 + $0x310] sm:$0xff] }
  0x61   :  { %2231 = vst [vmem:[#allocation71_spill] sm:$0xff] %v1846_v61  ;;  %2232 = vst [vmem:[#allocation72_spill] sm:$0xff] %v1848_v56  ;;  %v1852_v5 = vld [vmem:[#allocation2 + $0x318] sm:$0xff]  ;;  %v1854_v9 = vld [vmem:[#allocation2 + $0x320] sm:$0xff] }
  0x62   :  { %2233 = vst [vmem:[#allocation73_spill] sm:$0xff] %v1850_v4  ;;  %2234 = vst [vmem:[#allocation74_spill] sm:$0xff] %v1852_v5  ;;  %v1856_v8 = vld [vmem:[#allocation2 + $0x328] sm:$0xff]  ;;  %v1858_v10 = vld [vmem:[#allocation2 + $0x330] sm:$0xff] }
  0x63   :  { %2235 = vst [vmem:[#allocation75_spill] sm:$0xff] %v1854_v9  ;;  %2236 = vst [vmem:[#allocation76_spill] sm:$0xff] %v1856_v8  ;;  %v1860_v6 = vld [vmem:[#allocation2 + $0x338] sm:$0xff]  ;;  %v1862_v60 = vld [vmem:[#allocation2 + $0x340] sm:$0xff] }
  0x64   :  { %2237 = vst [vmem:[#allocation77_spill] sm:$0xff] %v1858_v10  ;;  %2238 = vst [vmem:[#allocation78_spill] sm:$0xff] %v1860_v6  ;;  %v1864_v0 = vld [vmem:[#allocation2 + $0x348] sm:$0xff]  ;;  %v1866_v1 = vld [vmem:[#allocation2 + $0x350] sm:$0xff] }
  0x65   :  { %2239 = vst [vmem:[#allocation79_spill] sm:$0xff] %v1862_v60  ;;  %2240 = vst [vmem:[#allocation80_spill] sm:$0xff] %v1864_v0  ;;  %v1868_v61 = vld [vmem:[#allocation2 + $0x358] sm:$0xff]  ;;  %v1870_v56 = vld [vmem:[#allocation2 + $0x360] sm:$0xff] }
  0x66   :  { %2241 = vst [vmem:[#allocation81_spill] sm:$0xff] %v1866_v1  ;;  %2242 = vst [vmem:[#allocation82_spill] sm:$0xff] %v1868_v61  ;;  %v1872_v4 = vld [vmem:[#allocation2 + $0x368] sm:$0xff]  ;;  %v1874_v5 = vld [vmem:[#allocation2 + $0x370] sm:$0xff] }
  0x67   :  { %2243 = vst [vmem:[#allocation83_spill] sm:$0xff] %v1870_v56  ;;  %2244 = vst [vmem:[#allocation84_spill] sm:$0xff] %v1872_v4  ;;  %v1876_v9 = vld [vmem:[#allocation2 + $0x378] sm:$0xff]  ;;  %v1878_v8 = vld [vmem:[#allocation2 + $0x380] sm:$0xff] }
  0x68   :  { %2245 = vst [vmem:[#allocation85_spill] sm:$0xff] %v1874_v5  ;;  %2246 = vst [vmem:[#allocation86_spill] sm:$0xff] %v1876_v9  ;;  %v1880_v10 = vld [vmem:[#allocation2 + $0x388] sm:$0xff]  ;;  %v1882_v6 = vld [vmem:[#allocation2 + $0x390] sm:$0xff] }
  0x69   :  { %2247 = vst [vmem:[#allocation87_spill] sm:$0xff] %v1878_v8  ;;  %2248 = vst [vmem:[#allocation88_spill] sm:$0xff] %v1880_v10  ;;  %v1884_v60 = vld [vmem:[#allocation2 + $0x398] sm:$0xff]  ;;  %v1886_v0 = vld [vmem:[#allocation2 + $0x3a0] sm:$0xff] }
  0x6a   :  { %2249 = vst [vmem:[#allocation89_spill] sm:$0xff] %v1882_v6  ;;  %2250 = vst [vmem:[#allocation90_spill] sm:$0xff] %v1884_v60  ;;  %v1888_v1 = vld [vmem:[#allocation2 + $0x3a8] sm:$0xff]  ;;  %v1890_v61 = vld [vmem:[#allocation2 + $0x3b0] sm:$0xff] }
  0x6b   :  { %2251 = vst [vmem:[#allocation91_spill] sm:$0xff] %v1886_v0  ;;  %2252 = vst [vmem:[#allocation92_spill] sm:$0xff] %v1888_v1  ;;  %v1892_v56 = vld [vmem:[#allocation2 + $0x3b8] sm:$0xff]  ;;  %v1894_v4 = vld [vmem:[#allocation2 + $0x3c0] sm:$0xff] }
  0x6c   :  { %2253 = vst [vmem:[#allocation93_spill] sm:$0xff] %v1890_v61  ;;  %2254 = vst [vmem:[#allocation94_spill] sm:$0xff] %v1892_v56  ;;  %v1896_v5 = vld [vmem:[#allocation2 + $0x3c8] sm:$0xff]  ;;  %v1898_v9 = vld [vmem:[#allocation2 + $0x3d0] sm:$0xff] }
  0x6d   :  { %2255 = vst [vmem:[#allocation95_spill] sm:$0xff] %v1894_v4  ;;  %2256 = vst [vmem:[#allocation96_spill] sm:$0xff] %v1896_v5  ;;  %v1900_v8 = vld [vmem:[#allocation2 + $0x3d8] sm:$0xff]  ;;  %v1902_v10 = vld [vmem:[#allocation2 + $0x3e0] sm:$0xff] }
  0x6e   :  { %2257 = vst [vmem:[#allocation97_spill] sm:$0xff] %v1898_v9  ;;  %2258 = vst [vmem:[#allocation98_spill] sm:$0xff] %v1900_v8  ;;  %v1904_v6 = vld [vmem:[#allocation2 + $0x3e8] sm:$0xff]  ;;  %v1906_v60 = vld [vmem:[#allocation2 + $0x3f0] sm:$0xff] }
  0x6f   :  { %2259 = vst [vmem:[#allocation99_spill] sm:$0xff] %v1902_v10  ;;  %2260 = vst [vmem:[#allocation100_spill] sm:$0xff] %v1904_v6  ;;  %v1908_v0 = vld [vmem:[#allocation2 + $0x3f8] sm:$0xff] }
  0x70   :  { %2261 = vst [vmem:[#allocation101_spill] sm:$0xff] %v1906_v60  ;;  %2262 = vst [vmem:[#allocation102_spill] sm:$0xff] %v1908_v0 }
  0x71   :  { %1513 = dma.done.wait [#allocation4 + $0x1], 8704 }
  0x72   :  { %1514 = vsyncadd [#allocation4 + $0x1], 4294958592  ;;  %406 = vmatprep.mubr.bf16.mxu0 %v1650_v12  ;;  %v2179_v61 = vmov 0   ;;  %v303_v56 = vld [vmem:[#allocation2 + $0x408] sm:$0xff]  ;;  %v302_v9 = vld [vmem:[#allocation2 + $0x400] sm:$0xff]  ;;  %vm370_vm0 = vcmask 130048  }
  0x73   :  { %447 = vmatprep.mubr.bf16.mxu1 %v2179_v61  ;;  %v367_v4 = vld [vmem:[#allocation2 + $0x608] sm:$0xff]  ;;  %374 = vmatprep.subr.bf16.mxu0 %v303_v56  ;;  %v366_v8 = vld [vmem:[#allocation2 + $0x600] sm:$0xff]  ;;  %v305_v5 = vld [vmem:[#allocation2 + $0x418] sm:$0xff] }
  0x74   :  { %415 = vmatprep.subr.bf16.mxu1 %v367_v4  ;;  %v307_v10 = vld [vmem:[#allocation2 + $0x428] sm:$0xff]  ;;  %375 = vmatpush1.bf16.msra.mxu0 %v302_v9  ;;  %v306_v60 = vld [vmem:[#allocation2 + $0x420] sm:$0xff]  ;;  %v304_v0 = vld [vmem:[#allocation2 + $0x410] sm:$0xff] }
  0x75   :  { %416 = vmatpush1.bf16.msra.mxu1 %v366_v8  ;;  %376 = vmatprep.subr.bf16.mxu0 %v307_v10  ;;  %v311_v6 = vld [vmem:[#allocation2 + $0x448] sm:$0xff]  ;;  %v309_v1 = vld [vmem:[#allocation2 + $0x438] sm:$0xff]  ;;  %v310_v56 = vld [vmem:[#allocation2 + $0x440] sm:$0xff] }
  0x76   :  { %456 = vmatprep.subr.bf16.mxu1 %v305_v5  ;;  %v308_v4 = vld [vmem:[#allocation2 + $0x430] sm:$0xff]  ;;  %v315_v61 = vld [vmem:[#allocation2 + $0x468] sm:$0xff]  ;;  %v313_v57 = vld [vmem:[#allocation2 + $0x458] sm:$0xff] }
  0x77   :  { %v314_v8 = vld [vmem:[#allocation2 + $0x460] sm:$0xff]  ;;  %v312_v10 = vld [vmem:[#allocation2 + $0x450] sm:$0xff]  ;;  %v319_v5 = vld [vmem:[#allocation2 + $0x488] sm:$0xff] }
  0x78   :  { %1349 = vmatmul.mubr.msk.bf16.vlgmr.msra.gmra.mrb[0].mxu1 %vm370_vm0, %v1652_v13  ;;  %377 = vmatpush1.bf16.msra.mxu0 %v306_v60  ;;  %v317_v9 = vld [vmem:[#allocation2 + $0x478] sm:$0xff]  ;;  %v316_v60 = vld [vmem:[#allocation2 + $0x470] sm:$0xff] }
  0x79   :  { %457 = vmatpush1.bf16.msra.mxu1 %v304_v0  ;;  %378 = vmatprep.subr.bf16.mxu0 %v311_v6  ;;  %v318_v6 = vld [vmem:[#allocation2 + $0x480] sm:$0xff]  ;;  %v323_v0 = vld [vmem:[#allocation2 + $0x4a8] sm:$0xff] }
  0x7a   :  { %458 = vmatprep.subr.bf16.mxu1 %v309_v1  ;;  %488 = vmatprep.mubr.bf16.mxu1 %v1650_v12  ;;  %v321_v1 = vld [vmem:[#allocation2 + $0x498] sm:$0xff]  ;;  %v322_v12 = vld [vmem:[#allocation2 + $0x4a0] sm:$0xff] }
  0x7c   :  { %379 = vmatpush1.bf16.msra.mxu0 %v310_v56  ;;  %v320_v56 = vld [vmem:[#allocation2 + $0x490] sm:$0xff] }
  0x7d   :  { %459 = vmatpush1.bf16.msra.mxu1 %v308_v4  ;;  %380 = vmatprep.subr.bf16.mxu0 %v315_v61  ;;  %v327_v61 = vld [vmem:[#allocation2 + $0x4c8] sm:$0xff]  ;;  %v326_v4 = vld [vmem:[#allocation2 + $0x4c0] sm:$0xff] }
  0x7e   :  { %460 = vmatprep.subr.bf16.mxu1 %v313_v57  ;;  %v325_v57 = vld [vmem:[#allocation2 + $0x4b8] sm:$0xff] }
  0x80   :  { %381 = vmatpush1.bf16.msra.mxu0 %v314_v8  ;;  %v324_v8 = vld [vmem:[#allocation2 + $0x4b0] sm:$0xff] }
  0x81   :  { %461 = vmatpush1.bf16.msra.mxu1 %v312_v10  ;;  %382 = vmatprep.subr.bf16.mxu0 %v319_v5  ;;  %v331_v10 = vld [vmem:[#allocation2 + $0x4e8] sm:$0xff]  ;;  %v329_v5 = vld [vmem:[#allocation2 + $0x4d8] sm:$0xff] }
  0x82   :  { %462 = vmatprep.subr.bf16.mxu1 %v317_v9  ;;  %v330_v9 = vld [vmem:[#allocation2 + $0x4e0] sm:$0xff] }
  0x84   :  { %383 = vmatpush1.bf16.msra.mxu0 %v318_v6  ;;  %v328_v6 = vld [vmem:[#allocation2 + $0x4d0] sm:$0xff] }
  0x85   :  { %463 = vmatpush1.bf16.msra.mxu1 %v316_v60  ;;  %384 = vmatprep.subr.bf16.mxu0 %v323_v0  ;;  %v335_v60 = vld [vmem:[#allocation2 + $0x508] sm:$0xff]  ;;  %v333_v0 = vld [vmem:[#allocation2 + $0x4f8] sm:$0xff] }
  0x86   :  { %464 = vmatprep.subr.bf16.mxu1 %v321_v1  ;;  %v334_v1 = vld [vmem:[#allocation2 + $0x500] sm:$0xff] }
  0x88   :  { %385 = vmatpush1.bf16.msra.mxu0 %v322_v12  ;;  %v332_v12 = vld [vmem:[#allocation2 + $0x4f0] sm:$0xff] }
  0x89   :  { %465 = vmatpush1.bf16.msra.mxu1 %v320_v56  ;;  %386 = vmatprep.subr.bf16.mxu0 %v327_v61  ;;  %v339_v56 = vld [vmem:[#allocation2 + $0x528] sm:$0xff]  ;;  %v337_v61 = vld [vmem:[#allocation2 + $0x518] sm:$0xff] }
  0x8a   :  { %466 = vmatprep.subr.bf16.mxu1 %v325_v57  ;;  %v338_v57 = vld [vmem:[#allocation2 + $0x520] sm:$0xff] }
  0x8c   :  { %387 = vmatpush1.bf16.msra.mxu0 %v326_v4  ;;  %v336_v4 = vld [vmem:[#allocation2 + $0x510] sm:$0xff] }
  0x8d   :  { %467 = vmatpush1.bf16.msra.mxu1 %v324_v8  ;;  %388 = vmatprep.subr.bf16.mxu0 %v331_v10  ;;  %v343_v8 = vld [vmem:[#allocation2 + $0x548] sm:$0xff]  ;;  %v341_v10 = vld [vmem:[#allocation2 + $0x538] sm:$0xff] }
  0x8e   :  { %468 = vmatprep.subr.bf16.mxu1 %v329_v5  ;;  %v342_v5 = vld [vmem:[#allocation2 + $0x540] sm:$0xff] }
  0x90   :  { %389 = vmatpush1.bf16.msra.mxu0 %v330_v9  ;;  %v340_v9 = vld [vmem:[#allocation2 + $0x530] sm:$0xff] }
  0x91   :  { %469 = vmatpush1.bf16.msra.mxu1 %v328_v6  ;;  %390 = vmatprep.subr.bf16.mxu0 %v335_v60  ;;  %v347_v6 = vld [vmem:[#allocation2 + $0x568] sm:$0xff]  ;;  %v345_v60 = vld [vmem:[#allocation2 + $0x558] sm:$0xff] }
  0x92   :  { %470 = vmatprep.subr.bf16.mxu1 %v333_v0  ;;  %v346_v0 = vld [vmem:[#allocation2 + $0x560] sm:$0xff] }
  0x94   :  { %391 = vmatpush1.bf16.msra.mxu0 %v334_v1  ;;  %v344_v1 = vld [vmem:[#allocation2 + $0x550] sm:$0xff] }
  0x95   :  { %471 = vmatpush1.bf16.msra.mxu1 %v332_v12  ;;  %392 = vmatprep.subr.bf16.mxu0 %v339_v56  ;;  %v351_v12 = vld [vmem:[#allocation2 + $0x588] sm:$0xff]  ;;  %v349_v56 = vld [vmem:[#allocation2 + $0x578] sm:$0xff] }
  0x96   :  { %472 = vmatprep.subr.bf16.mxu1 %v337_v61  ;;  %v350_v61 = vld [vmem:[#allocation2 + $0x580] sm:$0xff] }
  0x98   :  { %393 = vmatpush1.bf16.msra.mxu0 %v338_v57  ;;  %v348_v57 = vld [vmem:[#allocation2 + $0x570] sm:$0xff] }
  0x99   :  { %473 = vmatpush1.bf16.msra.mxu1 %v336_v4  ;;  %394 = vmatprep.subr.bf16.mxu0 %v343_v8  ;;  %v355_v4 = vld [vmem:[#allocation2 + $0x5a8] sm:$0xff]  ;;  %v353_v8 = vld [vmem:[#allocation2 + $0x598] sm:$0xff] }
  0x9a   :  { %474 = vmatprep.subr.bf16.mxu1 %v341_v10  ;;  %v354_v10 = vld [vmem:[#allocation2 + $0x5a0] sm:$0xff] }
  0x9c   :  { %395 = vmatpush1.bf16.msra.mxu0 %v342_v5  ;;  %v352_v5 = vld [vmem:[#allocation2 + $0x590] sm:$0xff] }
  0x9d   :  { %475 = vmatpush1.bf16.msra.mxu1 %v340_v9  ;;  %396 = vmatprep.subr.bf16.mxu0 %v347_v6  ;;  %v359_v9 = vld [vmem:[#allocation2 + $0x5c8] sm:$0xff]  ;;  %v357_v6 = vld [vmem:[#allocation2 + $0x5b8] sm:$0xff] }
  0x9e   :  { %476 = vmatprep.subr.bf16.mxu1 %v345_v60  ;;  %v358_v60 = vld [vmem:[#allocation2 + $0x5c0] sm:$0xff] }
  0xa0   :  { %397 = vmatpush1.bf16.msra.mxu0 %v346_v0  ;;  %v356_v0 = vld [vmem:[#allocation2 + $0x5b0] sm:$0xff] }
  0xa1   :  { %477 = vmatpush1.bf16.msra.mxu1 %v344_v1  ;;  %398 = vmatprep.subr.bf16.mxu0 %v351_v12  ;;  %v363_v1 = vld [vmem:[#allocation2 + $0x5e8] sm:$0xff]  ;;  %v361_v12 = vld [vmem:[#allocation2 + $0x5d8] sm:$0xff] }
  0xa2   :  { %478 = vmatprep.subr.bf16.mxu1 %v349_v56  ;;  %v362_v56 = vld [vmem:[#allocation2 + $0x5e0] sm:$0xff] }
  0xa4   :  { %399 = vmatpush1.bf16.msra.mxu0 %v350_v61  ;;  %v360_v61 = vld [vmem:[#allocation2 + $0x5d0] sm:$0xff] }
  0xa5   :  { %479 = vmatpush1.bf16.msra.mxu1 %v348_v57  ;;  %400 = vmatprep.subr.bf16.mxu0 %v355_v4  ;;  %v365_v57 = vld [vmem:[#allocation2 + $0x5f8] sm:$0xff]  ;;  %v364_v4 = vld [vmem:[#allocation2 + $0x5f0] sm:$0xff] }
  0xa6   :  { %480 = vmatprep.subr.bf16.mxu1 %v353_v8  ;;  %v369_v8 = vld [vmem:[#allocation2 + $0x618] sm:$0xff] }
  0xa8   :  { %401 = vmatpush1.bf16.msra.mxu0 %v354_v10  ;;  %v368_v10 = vld [vmem:[#allocation2 + $0x610] sm:$0xff] }
  0xa9   :  { %481 = vmatpush1.bf16.msra.mxu1 %v352_v5  ;;  %402 = vmatprep.subr.bf16.mxu0 %v359_v9  ;;  %v2314_v5 = vld [vmem:[#allocation66_spill] sm:$0xff]  ;;  %v2315_v9 = vld [vmem:[#allocation80_spill] sm:$0xff] }
  0xaa   :  { %482 = vmatprep.subr.bf16.mxu1 %v357_v6  ;;  %v2316_v6 = vld [vmem:[#allocation65_spill] sm:$0xff] }
  0xac   :  { %403 = vmatpush1.bf16.msra.mxu0 %v358_v60  ;;  %v2317_v60 = vld [vmem:[#allocation79_spill] sm:$0xff] }
  0xad   :  { %483 = vmatpush1.bf16.msra.mxu1 %v356_v0  ;;  %404 = vmatprep.subr.bf16.mxu0 %v363_v1  ;;  %v2318_v0 = vld [vmem:[#allocation70_spill] sm:$0xff]  ;;  %v2319_v1 = vld [vmem:[#allocation84_spill] sm:$0xff] }
  0xae   :  { %484 = vmatprep.subr.bf16.mxu1 %v361_v12  ;;  %v2320_v12 = vld [vmem:[#allocation69_spill] sm:$0xff] }
  0xb0   :  { %405 = vmatpush1.bf16.msra.mxu0 %v362_v56  ;;  %v2321_v56 = vld [vmem:[#allocation83_spill] sm:$0xff] }
  0xb1   :  { %485 = vmatpush1.bf16.msra.mxu1 %v360_v61  ;;  %538 = vmatprep.subr.bf16.mxu0 %v1656_v15  ;;  %v2263_v15 = vmov 0   ;;  %v2322_v61 = vld [vmem:[#allocation74_spill] sm:$0xff] }
  0xb2   :  { %486 = vmatprep.subr.bf16.mxu1 %v365_v57  ;;  %v2323_v57 = vld [vmem:[#allocation88_spill] sm:$0xff] }
  0xb3   :  { %407 = vmatmul.mubr.bf16.vlgmr.msra.gmra.mrb[0].mxu0 %v1648_v11 }
  0xb4   :  { %539 = vmatpush1.bf16.msra.mxu0 %v1654_v14  ;;  %570 = vmatprep.mubr.bf16.mxu0 %v1642_v7  ;;  %v2267_v14 = vld [vmem:[#allocation31_spill] sm:$0xff] }
  0xb5   :  { %487 = vmatpush1.bf16.msra.mxu1 %v364_v4  ;;  %540 = vmatprep.subr.bf16.mxu0 %v1664_v19  ;;  %v2271_v19 = vld [vmem:[#allocation35_spill] sm:$0xff]  ;;  %v2324_v4 = vld [vmem:[#allocation73_spill] sm:$0xff] }
  0xb6   :  { %497 = vmatprep.subr.bf16.mxu1 %v369_v8  ;;  %v2325_v8 = vld [vmem:[#allocation87_spill] sm:$0xff] }
  0xb8   :  { %489 = vmatmul.mubr.bf16.vlgmr.msra.gmra.mrb[4].mxu1 %v1648_v11  ;;  %541 = vmatpush1.bf16.msra.mxu0 %v1662_v18  ;;  %v2265_v11 = vld [vmem:[#allocation32_spill] sm:$0xff]  ;;  %v2270_v18 = vld [vmem:[#allocation25_spill] sm:$0xff] }
  0xb9   :  { %498 = vmatpush1.bf16.msra.mxu1 %v368_v10  ;;  %542 = vmatprep.subr.bf16.mxu0 %v1672_v23  ;;  %v2275_v23 = vld [vmem:[#allocation27_spill] sm:$0xff]  ;;  %v2326_v10 = vld [vmem:[#allocation78_spill] sm:$0xff] }
  0xba   :  { %529 = vmatprep.mubr.bf16.mxu1 %v2263_v15  ;;  %620 = vmatprep.subr.bf16.mxu1 %v1660_v17  ;;  %v2269_v17 = vld [vmem:[#allocation36_spill] sm:$0xff] }
  0xbb   :  { %v2327_v15 = vld [vmem:[#allocation92_spill] sm:$0xff] }
  0xbc   :  { %543 = vmatpush1.bf16.msra.mxu0 %v1670_v22  ;;  %v2274_v22 = vld [vmem:[#allocation20_spill] sm:$0xff] }
  0xbd   :  { %544 = vmatprep.subr.bf16.mxu0 %v1680_v27  ;;  %v2279_v27 = vld [vmem:[#allocation22_spill] sm:$0xff] }
  0xc0   :  { %545 = vmatpush1.bf16.msra.mxu0 %v1678_v26  ;;  %v2278_v26 = vld [vmem:[#allocation44_spill] sm:$0xff] }
  0xc1   :  { %546 = vmatprep.subr.bf16.mxu0 %v1688_v31  ;;  %v2283_v31 = vld [vmem:[#allocation48_spill] sm:$0xff] }
  0xc4   :  { %1350 = vmatmul.mubr.msk.bf16.vlgmr.msra.gmra.mrb[4].mxu1 %vm370_vm0, %v1652_v13  ;;  %547 = vmatpush1.bf16.msra.mxu0 %v1686_v30  ;;  %v2266_v13 = vld [vmem:[#allocation23_spill] sm:$0xff]  ;;  %v2282_v30 = vld [vmem:[#allocation34_spill] sm:$0xff] }
  0xc5   :  { %621 = vmatpush1.bf16.msra.mxu1 %v1658_v16  ;;  %548 = vmatprep.subr.bf16.mxu0 %v1696_v35  ;;  %v2268_v16 = vld [vmem:[#allocation26_spill] sm:$0xff]  ;;  %v2287_v35 = vld [vmem:[#allocation52_spill] sm:$0xff] }
  0xc6   :  { %622 = vmatprep.subr.bf16.mxu1 %v1668_v21  ;;  %652 = vmatprep.mubr.bf16.mxu1 %v1642_v7  ;;  %v2264_v7 = vld [vmem:[#allocation24_spill] sm:$0xff] }
  0xc7   :  { %v2273_v21 = vld [vmem:[#allocation40_spill] sm:$0xff] }
  0xc8   :  { %549 = vmatpush1.bf16.msra.mxu0 %v1694_v34  ;;  %v2286_v34 = vld [vmem:[#allocation38_spill] sm:$0xff] }
  0xc9   :  { %623 = vmatpush1.bf16.msra.mxu1 %v1666_v20  ;;  %550 = vmatprep.subr.bf16.mxu0 %v1704_v39  ;;  %v2272_v20 = vld [vmem:[#allocation28_spill] sm:$0xff] }
  0xca   :  { %624 = vmatprep.subr.bf16.mxu1 %v1676_v25  ;;  %v2277_v25 = vld [vmem:[#allocation30_spill] sm:$0xff]  ;;  %v2291_v39 = vld [vmem:[#allocation56_spill] sm:$0xff] }
  0xcc   :  { %551 = vmatpush1.bf16.msra.mxu0 %v1702_v38  ;;  %v2290_v38 = vld [vmem:[#allocation42_spill] sm:$0xff] }
  0xcd   :  { %625 = vmatpush1.bf16.msra.mxu1 %v1674_v24  ;;  %552 = vmatprep.subr.bf16.mxu0 %v1712_v43  ;;  %v2276_v24 = vld [vmem:[#allocation39_spill] sm:$0xff]  ;;  %v2295_v43 = vld [vmem:[#allocation60_spill] sm:$0xff] }
  0xce   :  { %626 = vmatprep.subr.bf16.mxu1 %v1684_v29  ;;  %v2281_v29 = vld [vmem:[#allocation43_spill] sm:$0xff] }
  0xd0   :  { %553 = vmatpush1.bf16.msra.mxu0 %v1710_v42  ;;  %v2294_v42 = vld [vmem:[#allocation46_spill] sm:$0xff] }
  0xd1   :  { %627 = vmatpush1.bf16.msra.mxu1 %v1682_v28  ;;  %554 = vmatprep.subr.bf16.mxu0 %v1720_v47  ;;  %v2280_v28 = vld [vmem:[#allocation29_spill] sm:$0xff]  ;;  %v2299_v47 = vld [vmem:[#allocation64_spill] sm:$0xff] }
  0xd2   :  { %628 = vmatprep.subr.bf16.mxu1 %v1692_v33  ;;  %v2285_v33 = vld [vmem:[#allocation47_spill] sm:$0xff] }
  0xd4   :  { %555 = vmatpush1.bf16.msra.mxu0 %v1718_v46  ;;  %v2298_v46 = vld [vmem:[#allocation50_spill] sm:$0xff] }
  0xd5   :  { %629 = vmatpush1.bf16.msra.mxu1 %v1690_v32  ;;  %556 = vmatprep.subr.bf16.mxu0 %v1728_v51  ;;  %v2284_v32 = vld [vmem:[#allocation33_spill] sm:$0xff]  ;;  %v2303_v51 = vld [vmem:[#allocation68_spill] sm:$0xff] }
  0xd6   :  { %630 = vmatprep.subr.bf16.mxu1 %v1700_v37  ;;  %v2289_v37 = vld [vmem:[#allocation51_spill] sm:$0xff] }
  0xd8   :  { %557 = vmatpush1.bf16.msra.mxu0 %v1726_v50  ;;  %v2302_v50 = vld [vmem:[#allocation54_spill] sm:$0xff] }
  0xd9   :  { %631 = vmatpush1.bf16.msra.mxu1 %v1698_v36  ;;  %558 = vmatprep.subr.bf16.mxu0 %v1736_v55  ;;  %v2288_v36 = vld [vmem:[#allocation37_spill] sm:$0xff]  ;;  %v2307_v55 = vld [vmem:[#allocation72_spill] sm:$0xff] }
  0xda   :  { %632 = vmatprep.subr.bf16.mxu1 %v1708_v41  ;;  %v2293_v41 = vld [vmem:[#allocation55_spill] sm:$0xff] }
  0xdc   :  { %559 = vmatpush1.bf16.msra.mxu0 %v1734_v54  ;;  %v2306_v54 = vld [vmem:[#allocation58_spill] sm:$0xff] }
  0xdd   :  { %633 = vmatpush1.bf16.msra.mxu1 %v1706_v40  ;;  %560 = vmatprep.subr.bf16.mxu0 %v1744_v59  ;;  %v2292_v40 = vld [vmem:[#allocation41_spill] sm:$0xff]  ;;  %v2309_v59 = vld [vmem:[#allocation71_spill] sm:$0xff] }
  0xde   :  { %634 = vmatprep.subr.bf16.mxu1 %v1716_v45  ;;  %v2297_v45 = vld [vmem:[#allocation59_spill] sm:$0xff] }
  0xe0   :  { %561 = vmatpush1.bf16.msra.mxu0 %v1742_v58  ;;  %v2308_v58 = vld [vmem:[#allocation57_spill] sm:$0xff] }
  0xe1   :  { %635 = vmatpush1.bf16.msra.mxu1 %v1714_v44  ;;  %562 = vmatprep.subr.bf16.mxu0 %v1752_v63  ;;  %v2296_v44 = vld [vmem:[#allocation45_spill] sm:$0xff]  ;;  %v2311_v63 = vld [vmem:[#allocation76_spill] sm:$0xff] }
  0xe2   :  { %636 = vmatprep.subr.bf16.mxu1 %v1724_v49  ;;  %v2301_v49 = vld [vmem:[#allocation63_spill] sm:$0xff] }
  0xe4   :  { %563 = vmatpush1.bf16.msra.mxu0 %v1750_v62  ;;  %v2310_v62 = vld [vmem:[#allocation62_spill] sm:$0xff] }
  0xe5   :  { %637 = vmatpush1.bf16.msra.mxu1 %v1722_v48  ;;  %564 = vmatprep.subr.bf16.mxu0 %v1760_v3  ;;  %v2300_v48 = vld [vmem:[#allocation49_spill] sm:$0xff]  ;;  %v2313_v3 = vld [vmem:[#allocation75_spill] sm:$0xff] }
  0xe6   :  { %638 = vmatprep.subr.bf16.mxu1 %v1732_v53  ;;  %v2305_v53 = vld [vmem:[#allocation67_spill] sm:$0xff] }
  0xe8   :  { %565 = vmatpush1.bf16.msra.mxu0 %v1758_v2  ;;  %v2312_v2 = vld [vmem:[#allocation61_spill] sm:$0xff] }
  0xe9   :  { %639 = vmatpush1.bf16.msra.mxu1 %v1730_v52  ;;  %566 = vmatprep.subr.bf16.mxu0 %v2265_v11  ;;  %v2304_v52 = vld [vmem:[#allocation53_spill] sm:$0xff]  ;;  %v2329_v11 = vld [vmem:[#allocation91_spill] sm:$0xff] }
  0xea   :  { %640 = vmatprep.subr.bf16.mxu1 %v2264_v7  ;;  %v2328_v7 = vld [vmem:[#allocation77_spill] sm:$0xff] }
  0xec   :  { %567 = vmatpush1.bf16.msra.mxu0 %v2267_v14  ;;  %v2331_v14 = vld [vmem:[#allocation96_spill] sm:$0xff] }
  0xed   :  { %641 = vmatpush1.bf16.msra.mxu1 %v2266_v13  ;;  %568 = vmatprep.subr.bf16.mxu0 %v2269_v17  ;;  %v2330_v13 = vld [vmem:[#allocation82_spill] sm:$0xff]  ;;  %v2333_v17 = vld [vmem:[#allocation95_spill] sm:$0xff] }
  0xee   :  { %642 = vmatprep.subr.bf16.mxu1 %v2268_v16  ;;  %v2332_v16 = vld [vmem:[#allocation81_spill] sm:$0xff] }
  0xf0   :  { %569 = vmatpush1.bf16.msra.mxu0 %v2271_v19  ;;  %v2335_v19 = vld [vmem:[#allocation100_spill] sm:$0xff] }
  0xf1   :  { %643 = vmatpush1.bf16.msra.mxu1 %v2270_v18  ;;  %579 = vmatprep.subr.bf16.mxu0 %v2273_v21  ;;  %v2334_v18 = vld [vmem:[#allocation86_spill] sm:$0xff]  ;;  %v2337_v21 = vld [vmem:[#allocation99_spill] sm:$0xff] }
  0xf2   :  { %644 = vmatprep.subr.bf16.mxu1 %v2272_v20  ;;  %v2336_v20 = vld [vmem:[#allocation85_spill] sm:$0xff] }
  0xf3   :  { %571 = vmatmul.mubr.bf16.vlgmr.msra.gmra.mrb[4].mxu0 %v2274_v22 }
  0xf4   :  { %580 = vmatpush1.bf16.msra.mxu0 %v2276_v24  ;;  %611 = vmatprep.mubr.bf16.mxu0 %v2279_v27  ;;  %v2340_v24 = vld [vmem:[#allocation89_spill] sm:$0xff] }
  0xf5   :  { %645 = vmatpush1.bf16.msra.mxu1 %v2275_v23  ;;  %581 = vmatprep.subr.bf16.mxu0 %v2278_v26  ;;  %v2339_v23 = vld [vmem:[#allocation21_spill] sm:$0xff] }
  0xf6   :  { %646 = vmatprep.subr.bf16.mxu1 %v2277_v25  ;;  %v2341_v25 = vld [vmem:[#allocation94_spill] sm:$0xff]  ;;  %v2342_v26 = vld [vmem:[#allocation93_spill] sm:$0xff] }
  0xf8   :  { %582 = vmatpush1.bf16.msra.mxu0 %v2281_v29  ;;  %v2345_v29 = vld [vmem:[#allocation102_spill] sm:$0xff] }
  0xf9   :  { %647 = vmatpush1.bf16.msra.mxu1 %v2280_v28  ;;  %583 = vmatprep.subr.bf16.mxu0 %v2283_v31  ;;  %v2344_v28 = vld [vmem:[#allocation97_spill] sm:$0xff] }
  0xfa   :  { %648 = vmatprep.subr.bf16.mxu1 %v2282_v30  ;;  %v2346_v30 = vld [vmem:[#allocation101_spill] sm:$0xff] }
  0xfc   :  { %584 = vmatpush1.bf16.msra.mxu0 %v2285_v33 }
  0xfd   :  { %649 = vmatpush1.bf16.msra.mxu1 %v2284_v32  ;;  %585 = vmatprep.subr.bf16.mxu0 %v2287_v35 }
  0xfe   :  { %650 = vmatprep.subr.bf16.mxu1 %v2286_v34 }
 0x100   :  { %586 = vmatpush1.bf16.msra.mxu0 %v2289_v37 }
 0x101   :  { %651 = vmatpush1.bf16.msra.mxu1 %v2288_v36  ;;  %587 = vmatprep.subr.bf16.mxu0 %v2291_v39 }
 0x102   :  { %661 = vmatprep.subr.bf16.mxu1 %v2290_v38 }
 0x104   :  { %653 = vmatmul.mubr.bf16.vlgmr.msra.gmra.mrb[4].mxu1 %v2274_v22  ;;  %588 = vmatpush1.bf16.msra.mxu0 %v2293_v41  ;;  %v2338_v22 = vld [vmem:[#allocation90_spill] sm:$0xff] }
 0x105   :  { %662 = vmatpush1.bf16.msra.mxu1 %v2292_v40  ;;  %589 = vmatprep.subr.bf16.mxu0 %v2295_v43 }
 0x106   :  { %663 = vmatprep.subr.bf16.mxu1 %v2294_v42  ;;  %693 = vmatprep.mubr.bf16.mxu1 %v2279_v27  ;;  %v2343_v27 = vld [vmem:[#allocation98_spill] sm:$0xff] }
 0x108   :  { %590 = vmatpush1.bf16.msra.mxu0 %v2297_v45 }
 0x109   :  { %664 = vmatpush1.bf16.msra.mxu1 %v2296_v44  ;;  %591 = vmatprep.subr.bf16.mxu0 %v2299_v47 }
 0x10a   :  { %665 = vmatprep.subr.bf16.mxu1 %v2298_v46 }
 0x10c   :  { %592 = vmatpush1.bf16.msra.mxu0 %v2301_v49 }
 0x10d   :  { %666 = vmatpush1.bf16.msra.mxu1 %v2300_v48  ;;  %593 = vmatprep.subr.bf16.mxu0 %v2303_v51 }
 0x10e   :  { %667 = vmatprep.subr.bf16.mxu1 %v2302_v50 }
 0x110   :  { %594 = vmatpush1.bf16.msra.mxu0 %v2305_v53 }
 0x111   :  { %668 = vmatpush1.bf16.msra.mxu1 %v2304_v52  ;;  %595 = vmatprep.subr.bf16.mxu0 %v2307_v55 }
 0x112   :  { %669 = vmatprep.subr.bf16.mxu1 %v2306_v54 }
 0x114   :  { %596 = vmatpush1.bf16.msra.mxu0 %v2309_v59 }
 0x115   :  { %670 = vmatpush1.bf16.msra.mxu1 %v2308_v58  ;;  %597 = vmatprep.subr.bf16.mxu0 %v2311_v63 }
 0x116   :  { %671 = vmatprep.subr.bf16.mxu1 %v2310_v62 }
 0x118   :  { %598 = vmatpush1.bf16.msra.mxu0 %v2313_v3 }
 0x119   :  { %672 = vmatpush1.bf16.msra.mxu1 %v2312_v2  ;;  %599 = vmatprep.subr.bf16.mxu0 %v2315_v9 }
 0x11a   :  { %673 = vmatprep.subr.bf16.mxu1 %v2314_v5 }
 0x11c   :  { %600 = vmatpush1.bf16.msra.mxu0 %v2317_v60 }
 0x11d   :  { %674 = vmatpush1.bf16.msra.mxu1 %v2316_v6  ;;  %601 = vmatprep.subr.bf16.mxu0 %v2319_v1 }
 0x11e   :  { %675 = vmatprep.subr.bf16.mxu1 %v2318_v0 }
 0x120   :  { %602 = vmatpush1.bf16.msra.mxu0 %v2321_v56 }
 0x121   :  { %676 = vmatpush1.bf16.msra.mxu1 %v2320_v12  ;;  %603 = vmatprep.subr.bf16.mxu0 %v2323_v57 }
 0x122   :  { %677 = vmatprep.subr.bf16.mxu1 %v2322_v61 }
 0x124   :  { %604 = vmatpush1.bf16.msra.mxu0 %v2325_v8 }
 0x125   :  { %678 = vmatpush1.bf16.msra.mxu1 %v2324_v4  ;;  %605 = vmatprep.subr.bf16.mxu0 %v2327_v15 }
 0x126   :  { %679 = vmatprep.subr.bf16.mxu1 %v2326_v10 }
 0x128   :  { %606 = vmatpush1.bf16.msra.mxu0 %v2329_v11 }
 0x129   :  { %680 = vmatpush1.bf16.msra.mxu1 %v2328_v7  ;;  %607 = vmatprep.subr.bf16.mxu0 %v2331_v14 }
 0x12a   :  { %681 = vmatprep.subr.bf16.mxu1 %v2330_v13 }
 0x12c   :  { %608 = vmatpush1.bf16.msra.mxu0 %v2333_v17 }
 0x12d   :  { %682 = vmatpush1.bf16.msra.mxu1 %v2332_v16  ;;  %609 = vmatprep.subr.bf16.mxu0 %v2335_v19 }
 0x12e   :  { %683 = vmatprep.subr.bf16.mxu1 %v2334_v18 }
 0x130   :  { %610 = vmatpush1.bf16.msra.mxu0 %v2337_v21 }
 0x131   :  { %684 = vmatpush1.bf16.msra.mxu1 %v2336_v20 }
 0x132   :  { %685 = vmatprep.subr.bf16.mxu1 %v2338_v22 }
 0x133   :  { %612 = vmatmul.mubr.bf16.vlgmr.msra.gmra.mrb[4].mxu0 %v2339_v23 }
 0x135   :  { %686 = vmatpush1.bf16.msra.mxu1 %v2340_v24 }
 0x136   :  { %687 = vmatprep.subr.bf16.mxu1 %v2341_v25 }
 0x139   :  { %688 = vmatpush1.bf16.msra.mxu1 %v2342_v26 }
 0x13a   :  { %689 = vmatprep.subr.bf16.mxu1 %v2343_v27 }
 0x13d   :  { %690 = vmatpush1.bf16.msra.mxu1 %v2344_v28 }
 0x13e   :  { %691 = vmatprep.subr.bf16.mxu1 %v2345_v29 }
 0x141   :  { %692 = vmatpush1.bf16.msra.mxu1 %v2346_v30 }
 0x144   :  { %694 = vmatmul.mubr.bf16.vlgmr.msra.gmra.mrb[4].mxu1 %v2339_v23 }
 0x14b   :  { %v449_v31 = vpop.f32.mrb[0].mxu1 }
 0x14c   :  { %v451_v32 = vpop.f32.mrb[1].mxu1 }
 0x14d   :  { %v453_v33 = vpop.f32.mrb[2].mxu1 }
 0x14e   :  { %v454_v34 = vpop.f32.mrb[3].mxu1 }
 0x186   :  { %v408_v35 = vpop.f32.mrb[0].mxu0 }
 0x187   :  { %v450_v36 = vadd.f32 %v449_v31, %v408_v35  ;;  %v410_v37 = vpop.f32.mrb[1].mxu0 }
 0x188   :  { %v452_v38 = vadd.f32 %v451_v32, %v410_v37  ;;  %v412_v39 = vpop.f32.mrb[2].mxu0 }
 0x189   :  { %v413_v40 = vpop.f32.mrb[3].mxu0 }
 0x206   :  { %v613_v41 = vpop.f32.mrb[4].mxu0 }
 0x207   :  { %v2056_v42 = vadd.f32 %v613_v41, %v450_v36  ;;  %v615_v43 = vpop.f32.mrb[5].mxu0 }
 0x208   :  { %v2058_v44 = vadd.f32 %v615_v43, %v452_v38  ;;  %v617_v45 = vpop.f32.mrb[6].mxu0 }
 0x209   :  { %v702_v46 = vrot.slane %v2056_v42, 4  ;;  %v618_v47 = vpop.f32.mrb[7].mxu0 }
 0x20a   :  { %v708_v48 = vrot.slane %v2058_v44, 4 }
 0x20b   :  { %v703_v49 = vadd.f32 %v2056_v42, %v702_v46 }
 0x20c   :  { %v709_v50 = vadd.f32 %v2058_v44, %v708_v48 }
 0x20d   :  { %v704_v51 = vrot.slane %v703_v49, 2 }
 0x20e   :  { %v710_v52 = vrot.slane %v709_v50, 2 }
 0x20f   :  { %v705_v53 = vadd.f32 %v704_v51, %v703_v49 }
 0x210   :  { %v711_v54 = vadd.f32 %v710_v52, %v709_v50 }
 0x211   :  { %v706_v55 = vrot.slane %v705_v53, 1 }
 0x212   :  { %v712_v58 = vrot.slane %v711_v54, 1 }
 0x213   :  { %v707_v59 = vadd.f32 %v706_v55, %v705_v53 }
 0x214   :  { %v713_v62 = vadd.f32 %v712_v58, %v711_v54 }
 0x215   :  { %v2064_v63 = vmul.f32 0.125, %v707_v59  ;;  %v1536_v59 = vmov 1966171168  }
 0x216   :  { %v2066_v2 = vmul.f32 0.125, %v713_v62  ;;  %v783_v62 = vunpack.c.l.s4 %v1536_v59 }
 0x217   :  { %v2068_v3 = vpop.f32.mrb[4].mxu1  ;;  %v731_v5 = vsub.f32 %v2056_v42, %v2064_v63 }
 0x218   :  { %v714_v9 = vrot.slane %v2068_v3, 4  ;;  %v2073_v6 = vpop.f32.mrb[5].mxu1  ;;  %v732_v60 = vsub.f32 %v2058_v44, %v2066_v2 }
 0x219   :  { %v720_v0 = vrot.slane %v2073_v6, 4  ;;  %v699_v1 = vpop.f32.mrb[6].mxu1  ;;  %v735_v12 = vmul.f32 %v731_v5, %v731_v5  ;;  %v785_v5 = vlaneseq }
 0x21a   :  { %v715_v56 = vadd.f32 %v714_v9, %v2068_v3  ;;  %v700_v61 = vpop.f32.mrb[7].mxu1  ;;  %v736_v57 = vmul.f32 %v732_v60, %v732_v60  ;;  %v784_v60 = vunpack.c.0.s8 %v783_v62 }
 0x21b   :  { %v721_v4 = vadd.f32 %v720_v0, %v2073_v6  ;;  %v739_v8 = vrot.slane %v735_v12, 4  ;;  %v786_v0 = vshrl.u32 %v785_v5, 7 }
 0x21c   :  { %v716_v10 = vrot.slane %v715_v56, 2  ;;  %v745_v15 = vrot.slane %v736_v57, 4 }
 0x21d   :  { %v722_v7 = vrot.slane %v721_v4, 2  ;;  %v740_v11 = vadd.f32 %v739_v8, %v735_v12  ;;  %v2082_v61 = vsub.s32 %v784_v60, %v786_v0 }
 0x21e   :  { %v717_v13 = vadd.f32 %v716_v10, %v715_v56  ;;  %v746_v14 = vadd.f32 %v745_v15, %v736_v57 }
 0x21f   :  { %v723_v16 = vadd.f32 %v722_v7, %v721_v4  ;;  %v741_v17 = vrot.slane %v740_v11, 2  ;;  %v767_v7 = vld [vmem:[%s2167_s2] sm:$0xf] }
 0x220   :  { %v718_v18 = vrot.slane %v717_v13, 1  ;;  %v747_v19 = vrot.slane %v746_v14, 2 }
 0x221   :  { %v724_v20 = vrot.slane %v723_v16, 1  ;;  %v742_v21 = vadd.f32 %v741_v17, %v740_v11  ;;  %v2089_v11 = vsub.s32 0, %v786_v0  ;;  %v822_v17 = vsub.s32 3, %v786_v0 }
 0x222   :  { %v719_v22 = vadd.f32 %v718_v18, %v717_v13  ;;  %v748_v23 = vadd.f32 %v747_v19, %v746_v14  ;;  %v2092_v14 = vsub.s32 1, %v786_v0 }
 0x223   :  { %v725_v24 = vadd.f32 %v724_v20, %v723_v16  ;;  %v743_v27 = vrot.slane %v742_v21, 1  ;;  %v818_v16 = vsub.s32 2, %v786_v0 }
 0x224   :  { %v729_v25 = vmul.f32 0.125, %v719_v22  ;;  %v749_v29 = vrot.slane %v748_v23, 1 }
 0x225   :  { %v730_v26 = vmul.f32 0.125, %v725_v24  ;;  %v744_v33 = vadd.f32 %v743_v27, %v742_v21 }
 0x226   :  { %v733_v28 = vsub.f32 %v2068_v3, %v729_v25  ;;  %v750_v35 = vadd.f32 %v749_v29, %v748_v23 }
 0x227   :  { %v734_v30 = vsub.f32 %v2073_v6, %v730_v26  ;;  %v763_v39 = vmul.f32 0.125, %v744_v33 }
 0x228   :  { %v737_v31 = vmul.f32 %v733_v28, %v733_v28  ;;  %v764_v41 = vmul.f32 0.125, %v750_v35 }
 0x229   :  { %v738_v32 = vmul.f32 %v734_v30, %v734_v30  ;;  %v768_v47 = vadd.f32 1e-05, %v763_v39 }
 0x22a   :  { %v751_v34 = vrot.slane %v737_v31, 4  ;;  %v769_v49 = vadd.f32 1e-05, %v764_v41 }
 0x22b   :  { %v757_v36 = vrot.slane %v738_v32, 4  ;;  %1451 = vrsqrt.f32 %v768_v47 }
 0x22c   :  { %v752_v37 = vadd.f32 %v751_v34, %v737_v31  ;;  %1453 = vrsqrt.f32 %v769_v49 }
 0x22d   :  { %v758_v38 = vadd.f32 %v757_v36, %v738_v32  ;;  %v806_v36 = vld [vmem:[%s2168_s3] sm:$0xf] }
 0x22e   :  { %v753_v40 = vrot.slane %v752_v37, 2 }
 0x22f   :  { %v759_v43 = vrot.slane %v758_v38, 2 }
 0x230   :  { %v754_v45 = vadd.f32 %v753_v40, %v752_v37 }
 0x231   :  { %v760_v46 = vadd.f32 %v759_v43, %v758_v38 }
 0x232   :  { %v755_v48 = vrot.slane %v754_v45, 1 }
 0x233   :  { %v761_v50 = vrot.slane %v760_v46, 1 }
 0x234   :  { %v756_v51 = vadd.f32 %v755_v48, %v754_v45 }
 0x235   :  { %v762_v52 = vadd.f32 %v761_v50, %v760_v46  ;;  %v1452_v9 = vpop.eup %1451 }
 0x236   :  { %v765_v53 = vmul.f32 0.125, %v756_v51  ;;  %v1454_v1 = vpop.eup %1453 }
 0x237   :  { %v766_v54 = vmul.f32 0.125, %v762_v52  ;;  %v780_v56 = vcombine.low %v1452_v9, %v1454_v1 }
 0x238   :  { %v770_v55 = vadd.f32 1e-05, %v765_v53 }
 0x239   :  { %v771_v58 = vadd.f32 1e-05, %v766_v54  ;;  %v788_v8 = vrot.slane %v780_v56, %v2082_v61 }
 0x23a   :  { %1455 = vrsqrt.f32 %v770_v55 }
 0x23b   :  { %1457 = vrsqrt.f32 %v771_v58 }
 0x244   :  { %v1456_v12 = vpop.eup %1455 }
 0x245   :  { %v1458_v57 = vpop.eup %1457 }
 0x246   :  { %v781_v4 = vcombine.low %v1456_v12, %v1458_v57 }
 0x248   :  { %v795_v10 = vrot.slane %v781_v4, %v2082_v61 }
 0x24a   :  { %v796_v15 = vcombine.low %v788_v8, %v795_v10 }
 0x24c   :  { %v803_v13 = vrot.slane %v796_v15, %v2082_v61 }
 0x24e   :  { %v805_v18 = vmul.f32 %v803_v13, %v767_v7 }
 0x250   :  { %v811_v19 = vrot.slane %v805_v18, %v2089_v11  ;;  %v815_v20 = vrot.slane %v805_v18, %v2092_v14  ;;  %v819_v21 = vrot.slane %v805_v18, %v818_v16  ;;  %v823_v22 = vrot.slane %v805_v18, %v822_v17 }
 0x252   :  { %v828_v23 = vmul.f32 %v811_v19, %v2064_v63  ;;  %v829_v24 = vmul.f32 %v815_v20, %v2066_v2  ;;  %v830_v27 = vmul.f32 %v819_v21, %v729_v25  ;;  %v831_v28 = vmul.f32 %v823_v22, %v730_v26 }
 0x253   :  { %v864_v29 = vmul.f32 %v819_v21, %v2068_v3  ;;  %v865_v30 = vmul.f32 %v823_v22, %v2073_v6  ;;  %v862_v25 = vmul.f32 %v2056_v42, %v811_v19  ;;  %v863_v3 = vmul.f32 %v2058_v44, %v815_v20 }
 0x254   :  { %v836_v31 = vcombine.low %v828_v23, %v829_v24  ;;  %v837_v32 = vcombine.low %v830_v27, %v831_v28 }
 0x256   :  { %v844_v33 = vrot.slane %v836_v31, %v2082_v61  ;;  %v851_v34 = vrot.slane %v837_v32, %v2082_v61 }
 0x258   :  { %v852_v35 = vcombine.low %v844_v33, %v851_v34 }
 0x25a   :  { %v859_v63 = vrot.slane %v852_v35, %v2082_v61 }
 0x25c   :  { %v861_v2 = vsub.f32 %v806_v36, %v859_v63 }
 0x25e   :  { %v870_v6 = vrot.slane %v861_v2, %v2089_v11  ;;  %v874_v26 = vrot.slane %v861_v2, %v2092_v14  ;;  %v878_v37 = vrot.slane %v861_v2, %v818_v16  ;;  %v882_v38 = vrot.slane %v861_v2, %v822_v17 }
 0x260   :  { %v2110_v39 = vadd.f32 %v870_v6, %v862_v25  ;;  %v888_v40 = vadd.f32 %v874_v26, %v863_v3  ;;  %v2112_v41 = vadd.f32 %v878_v37, %v864_v29  ;;  %v2114_v43 = vadd.f32 %v882_v38, %v865_v30 }
 0x262   :  { %v891_v45 = vmax.f32 %v2110_v39, 0.0  ;;  %v892_v46 = vmax.f32 %v888_v40, 0.0  ;;  %v893_v42 = vmax.f32 %v2112_v41, 0.0  ;;  %v894_v44 = vmax.f32 %v2114_v43, 0.0 }
 0x263   :  { %1515 = dma.done.wait [#allocation4 + $0x2], 14336 }
 0x264   :  { %1516 = vsyncadd [#allocation4 + $0x2], 4294952960  ;;  %v900_v47 = vpack.c.bf16 %v892_v46, %v892_v46  ;;  %v904_v48 = vld [vmem:[#allocation3 + $0x8] sm:$0xff]  ;;  %v903_v49 = vld [vmem:[#allocation3] sm:$0xff]  ;;  %v899_v24 = vpack.c.bf16 %v891_v45, %v891_v45  ;;  %v902_v27 = vpack.c.bf16 %v894_v44, %v894_v44  ;;  %vm1538_vm1 = vmmov 0  }
 0x265   :  { %v906_v50 = vld [vmem:[#allocation3 + $0x18] sm:$0xff]  ;;  %967 = vmatprep.subr.bf16.mxu0 %v904_v48  ;;  %v905_v51 = vld [vmem:[#allocation3 + $0x10] sm:$0xff]  ;;  %v908_v52 = vld [vmem:[#allocation3 + $0x28] sm:$0xff] }
 0x266   :  { %999 = vmatprep.mubr.bf16.mxu0 %v900_v47  ;;  %968 = vmatpush1.bf16.msra.mxu0 %v903_v49  ;;  %v907_v53 = vld [vmem:[#allocation3 + $0x20] sm:$0xff]  ;;  %v910_v54 = vld [vmem:[#allocation3 + $0x38] sm:$0xff]  ;;  %v909_v55 = vld [vmem:[#allocation3 + $0x30] sm:$0xff] }
 0x267   :  { %969 = vmatprep.subr.bf16.mxu0 %v906_v50  ;;  %v912_v58 = vld [vmem:[#allocation3 + $0x48] sm:$0xff]  ;;  %v911_v59 = vld [vmem:[#allocation3 + $0x40] sm:$0xff]  ;;  %v914_v62 = vld [vmem:[#allocation3 + $0x58] sm:$0xff] }
 0x268   :  { %v913_v5 = vld [vmem:[#allocation3 + $0x50] sm:$0xff]  ;;  %v916_v9 = vld [vmem:[#allocation3 + $0x68] sm:$0xff]  ;;  %v915_v60 = vld [vmem:[#allocation3 + $0x60] sm:$0xff] }
 0x269   :  { %v918_v0 = vld [vmem:[#allocation3 + $0x78] sm:$0xff]  ;;  %v917_v1 = vld [vmem:[#allocation3 + $0x70] sm:$0xff]  ;;  %v920_v12 = vld [vmem:[#allocation3 + $0x88] sm:$0xff] }
 0x26a   :  { %970 = vmatpush1.bf16.msra.mxu0 %v905_v51  ;;  %v919_v56 = vld [vmem:[#allocation3 + $0x80] sm:$0xff]  ;;  %v922_v57 = vld [vmem:[#allocation3 + $0x98] sm:$0xff]  ;;  %v921_v4 = vld [vmem:[#allocation3 + $0x90] sm:$0xff] }
 0x26b   :  { %971 = vmatprep.subr.bf16.mxu0 %v908_v52  ;;  %v924_v8 = vld [vmem:[#allocation3 + $0xa8] sm:$0xff]  ;;  %v923_v10 = vld [vmem:[#allocation3 + $0xa0] sm:$0xff]  ;;  %v926_v15 = vld [vmem:[#allocation3 + $0xb8] sm:$0xff] }
 0x26c   :  { %v925_v7 = vld [vmem:[#allocation3 + $0xb0] sm:$0xff]  ;;  %v928_v13 = vld [vmem:[#allocation3 + $0xc8] sm:$0xff]  ;;  %v927_v16 = vld [vmem:[#allocation3 + $0xc0] sm:$0xff] }
 0x26d   :  { %v930_v17 = vld [vmem:[#allocation3 + $0xd8] sm:$0xff]  ;;  %v929_v18 = vld [vmem:[#allocation3 + $0xd0] sm:$0xff]  ;;  %v932_v19 = vld [vmem:[#allocation3 + $0xe8] sm:$0xff] }
 0x26e   :  { %972 = vmatpush1.bf16.msra.mxu0 %v907_v53  ;;  %v931_v20 = vld [vmem:[#allocation3 + $0xe0] sm:$0xff]  ;;  %v934_v21 = vld [vmem:[#allocation3 + $0xf8] sm:$0xff]  ;;  %v933_v22 = vld [vmem:[#allocation3 + $0xf0] sm:$0xff] }
 0x26f   :  { %973 = vmatprep.subr.bf16.mxu0 %v910_v54  ;;  %v936_v23 = vld [vmem:[#allocation3 + $0x108] sm:$0xff]  ;;  %v935_v28 = vld [vmem:[#allocation3 + $0x100] sm:$0xff]  ;;  %v938_v29 = vld [vmem:[#allocation3 + $0x118] sm:$0xff] }
 0x270   :  { %v937_v30 = vld [vmem:[#allocation3 + $0x110] sm:$0xff]  ;;  %v940_v31 = vld [vmem:[#allocation3 + $0x128] sm:$0xff]  ;;  %v939_v32 = vld [vmem:[#allocation3 + $0x120] sm:$0xff] }
 0x271   :  { %v942_v33 = vld [vmem:[#allocation3 + $0x138] sm:$0xff]  ;;  %v941_v34 = vld [vmem:[#allocation3 + $0x130] sm:$0xff]  ;;  %v944_v35 = vld [vmem:[#allocation3 + $0x148] sm:$0xff] }
 0x272   :  { %974 = vmatpush1.bf16.msra.mxu0 %v909_v55  ;;  %v943_v36 = vld [vmem:[#allocation3 + $0x140] sm:$0xff]  ;;  %v946_v63 = vld [vmem:[#allocation3 + $0x158] sm:$0xff]  ;;  %v945_v2 = vld [vmem:[#allocation3 + $0x150] sm:$0xff]  ;;  %v901_v55 = vpack.c.bf16 %v893_v42, %v893_v42 }
 0x273   :  { %975 = vmatprep.subr.bf16.mxu0 %v912_v58  ;;  %v948_v25 = vld [vmem:[#allocation3 + $0x168] sm:$0xff]  ;;  %v947_v3 = vld [vmem:[#allocation3 + $0x160] sm:$0xff]  ;;  %v950_v6 = vld [vmem:[#allocation3 + $0x178] sm:$0xff] }
 0x274   :  { %v949_v26 = vld [vmem:[#allocation3 + $0x170] sm:$0xff]  ;;  %v952_v37 = vld [vmem:[#allocation3 + $0x188] sm:$0xff]  ;;  %v951_v38 = vld [vmem:[#allocation3 + $0x180] sm:$0xff] }
 0x275   :  { %v954_v39 = vld [vmem:[#allocation3 + $0x198] sm:$0xff]  ;;  %v953_v40 = vld [vmem:[#allocation3 + $0x190] sm:$0xff]  ;;  %v956_v43 = vld [vmem:[#allocation3 + $0x1a8] sm:$0xff] }
 0x276   :  { %976 = vmatpush1.bf16.msra.mxu0 %v911_v59  ;;  %v955_v45 = vld [vmem:[#allocation3 + $0x1a0] sm:$0xff]  ;;  %v958_v46 = vld [vmem:[#allocation3 + $0x1b8] sm:$0xff]  ;;  %v957_v44 = vld [vmem:[#allocation3 + $0x1b0] sm:$0xff] }
 0x277   :  { %977 = vmatprep.subr.bf16.mxu0 %v914_v62  ;;  %v960_v47 = vld [vmem:[#allocation3 + $0x1c8] sm:$0xff]  ;;  %v959_v48 = vld [vmem:[#allocation3 + $0x1c0] sm:$0xff]  ;;  %v962_v49 = vld [vmem:[#allocation3 + $0x1d8] sm:$0xff] }
 0x278   :  { %v961_v50 = vld [vmem:[#allocation3 + $0x1d0] sm:$0xff]  ;;  %v964_v51 = vld [vmem:[#allocation3 + $0x1e8] sm:$0xff]  ;;  %v963_v52 = vld [vmem:[#allocation3 + $0x1e0] sm:$0xff] }
 0x279   :  { %v966_v53 = vld [vmem:[#allocation3 + $0x1f8] sm:$0xff]  ;;  %v965_v54 = vld [vmem:[#allocation3 + $0x1f0] sm:$0xff]  ;;  %v1165_v58 = vld [vmem:[#allocation3 + $0x280] sm:$0xff] }
 0x27a   :  { %978 = vmatpush1.bf16.msra.mxu0 %v913_v5  ;;  %v1157_v59 = vld [vmem:[#allocation3 + $0x200] sm:$0xff]  ;;  %v1166_v62 = vld [vmem:[#allocation3 + $0x290] sm:$0xff]  ;;  %1355 = vmatprep.subr.bf16.mxu1 %v1165_v58 }
 0x27b   :  { %979 = vmatprep.subr.bf16.mxu0 %v916_v9  ;;  %1356 = vmatpush3.bf16.msra.mxu1 %v1157_v59  ;;  %v1158_v5 = vld [vmem:[#allocation3 + $0x210] sm:$0xff]  ;;  %v1167_v9 = vld [vmem:[#allocation3 + $0x2a0] sm:$0xff] }
 0x27c   :  { %1357 = vmatprep.subr.bf16.mxu1 %v1166_v62  ;;  %v1169_v41 = vld [vmem:[#allocation3 + $0x2c0] sm:$0xff] }
 0x27d   :  { %v1161_v42 = vld [vmem:[#allocation3 + $0x240] sm:$0xff] }
 0x27e   :  { %980 = vmatpush1.bf16.msra.mxu0 %v915_v60  ;;  %v1159_v60 = vld [vmem:[#allocation3 + $0x220] sm:$0xff] }
 0x27f   :  { %981 = vmatprep.subr.bf16.mxu0 %v918_v0  ;;  %1358 = vmatpush3.bf16.msra.mxu1 %v1158_v5  ;;  %v1168_v0 = vld [vmem:[#allocation3 + $0x2b0] sm:$0xff] }
 0x280   :  { %1359 = vmatprep.subr.bf16.mxu1 %v1167_v9 }
 0x282   :  { %982 = vmatpush1.bf16.msra.mxu0 %v917_v1  ;;  %v1160_v1 = vld [vmem:[#allocation3 + $0x230] sm:$0xff] }
 0x283   :  { %983 = vmatprep.subr.bf16.mxu0 %v920_v12  ;;  %1360 = vmatpush3.bf16.msra.mxu1 %v1159_v60  ;;  %v1170_v12 = vld [vmem:[#allocation3 + $0x2d0] sm:$0xff] }
 0x284   :  { %1361 = vmatprep.subr.bf16.mxu1 %v1168_v0 }
 0x286   :  { %984 = vmatpush1.bf16.msra.mxu0 %v919_v56  ;;  %v1162_v56 = vld [vmem:[#allocation3 + $0x250] sm:$0xff] }
 0x287   :  { %985 = vmatprep.subr.bf16.mxu0 %v922_v57  ;;  %1362 = vmatpush3.bf16.msra.mxu1 %v1160_v1  ;;  %v1171_v57 = vld [vmem:[#allocation3 + $0x2e0] sm:$0xff] }
 0x288   :  { %1363 = vmatprep.subr.bf16.mxu1 %v1169_v41  ;;  %v1105_v41 = vld [vmem:[%s2171_s6] sm:$0x3] }
 0x28a   :  { %986 = vmatpush1.bf16.msra.mxu0 %v921_v4  ;;  %v1163_v4 = vld [vmem:[#allocation3 + $0x260] sm:$0xff] }
 0x28b   :  { %987 = vmatprep.subr.bf16.mxu0 %v924_v8  ;;  %1364 = vmatpush3.bf16.msra.mxu1 %v1161_v42  ;;  %v1172_v8 = vld [vmem:[#allocation3 + $0x2f0] sm:$0xff] }
 0x28c   :  { %1365 = vmatprep.subr.bf16.mxu1 %v1170_v12 }
 0x28e   :  { %988 = vmatpush1.bf16.msra.mxu0 %v923_v10  ;;  %v1164_v10 = vld [vmem:[#allocation3 + $0x270] sm:$0xff] }
 0x28f   :  { %989 = vmatprep.subr.bf16.mxu0 %v926_v15  ;;  %1366 = vmatpush3.bf16.msra.mxu1 %v1162_v56 }
 0x290   :  { %1367 = vmatprep.subr.bf16.mxu1 %v1171_v57 }
 0x292   :  { %990 = vmatpush1.bf16.msra.mxu0 %v925_v7 }
 0x293   :  { %991 = vmatprep.subr.bf16.mxu0 %v928_v13  ;;  %1368 = vmatpush3.bf16.msra.mxu1 %v1163_v4 }
 0x294   :  { %1369 = vmatprep.subr.bf16.mxu1 %v1172_v8 }
 0x296   :  { %992 = vmatpush1.bf16.msra.mxu0 %v927_v16 }
 0x297   :  { %993 = vmatprep.subr.bf16.mxu0 %v930_v17  ;;  %1370 = vmatpush3.bf16.msra.mxu1 %v1164_v10 }
 0x29a   :  { %994 = vmatpush1.bf16.msra.mxu0 %v929_v18 }
 0x29b   :  { %995 = vmatprep.subr.bf16.mxu0 %v932_v19 }
 0x29e   :  { %996 = vmatpush1.bf16.msra.mxu0 %v931_v20 }
 0x29f   :  { %997 = vmatprep.subr.bf16.mxu0 %v934_v21 }
 0x2a2   :  { %998 = vmatpush1.bf16.msra.mxu0 %v933_v22 }
 0x2a3   :  { %1008 = vmatprep.subr.bf16.mxu0 %v936_v23 }
 0x2a5   :  { %1000 = vmatmul.mubr.bf16.vlgmr.msra.gmra.mrb[8].mxu0 %v899_v24 }
 0x2a6   :  { %1009 = vmatpush1.bf16.msra.mxu0 %v935_v28  ;;  %1040 = vmatprep.mubr.bf16.mxu0 %v902_v27 }
 0x2a7   :  { %1010 = vmatprep.subr.bf16.mxu0 %v938_v29 }
 0x2aa   :  { %1011 = vmatpush1.bf16.msra.mxu0 %v937_v30 }
 0x2ab   :  { %1012 = vmatprep.subr.bf16.mxu0 %v940_v31 }
 0x2ae   :  { %1013 = vmatpush1.bf16.msra.mxu0 %v939_v32 }
 0x2af   :  { %1014 = vmatprep.subr.bf16.mxu0 %v942_v33 }
 0x2b2   :  { %1015 = vmatpush1.bf16.msra.mxu0 %v941_v34 }
 0x2b3   :  { %1016 = vmatprep.subr.bf16.mxu0 %v944_v35 }
 0x2b6   :  { %1017 = vmatpush1.bf16.msra.mxu0 %v943_v36 }
 0x2b7   :  { %1018 = vmatprep.subr.bf16.mxu0 %v946_v63 }
 0x2ba   :  { %1019 = vmatpush1.bf16.msra.mxu0 %v945_v2 }
 0x2bb   :  { %1020 = vmatprep.subr.bf16.mxu0 %v948_v25 }
 0x2be   :  { %1021 = vmatpush1.bf16.msra.mxu0 %v947_v3 }
 0x2bf   :  { %1022 = vmatprep.subr.bf16.mxu0 %v950_v6 }
 0x2c2   :  { %1023 = vmatpush1.bf16.msra.mxu0 %v949_v26 }
 0x2c3   :  { %1024 = vmatprep.subr.bf16.mxu0 %v952_v37 }
 0x2c6   :  { %1025 = vmatpush1.bf16.msra.mxu0 %v951_v38 }
 0x2c7   :  { %1026 = vmatprep.subr.bf16.mxu0 %v954_v39 }
 0x2ca   :  { %1027 = vmatpush1.bf16.msra.mxu0 %v953_v40 }
 0x2cb   :  { %1028 = vmatprep.subr.bf16.mxu0 %v956_v43 }
 0x2ce   :  { %1029 = vmatpush1.bf16.msra.mxu0 %v955_v45 }
 0x2cf   :  { %1030 = vmatprep.subr.bf16.mxu0 %v958_v46 }
 0x2d2   :  { %1031 = vmatpush1.bf16.msra.mxu0 %v957_v44 }
 0x2d3   :  { %1032 = vmatprep.subr.bf16.mxu0 %v960_v47 }
 0x2d6   :  { %1033 = vmatpush1.bf16.msra.mxu0 %v959_v48 }
 0x2d7   :  { %1034 = vmatprep.subr.bf16.mxu0 %v962_v49 }
 0x2da   :  { %1035 = vmatpush1.bf16.msra.mxu0 %v961_v50 }
 0x2db   :  { %1036 = vmatprep.subr.bf16.mxu0 %v964_v51 }
 0x2de   :  { %1037 = vmatpush1.bf16.msra.mxu0 %v963_v52 }
 0x2df   :  { %1038 = vmatprep.subr.bf16.mxu0 %v966_v53  ;;  %v1081_v53 = vld [vmem:[%s2170_s5] sm:$0x3] }
 0x2e2   :  { %1039 = vmatpush1.bf16.msra.mxu0 %v965_v54 }
 0x2e5   :  { %1041 = vmatmul.mubr.bf16.vlgmr.msra.gmra.mrb[8].mxu0 %v901_v55 }
 0x3b8   :  { %v1042_v15 = vpop.f32.mrb[8].mxu0 }
 0x3b9   :  { %v1049_v7 = vrot.slane %v1042_v15, 4  ;;  %v1044_v13 = vpop.f32.mrb[9].mxu0 }
 0x3ba   :  { %v1055_v16 = vrot.slane %v1044_v13, 4  ;;  %v1046_v17 = vpop.f32.mrb[10].mxu0 }
 0x3bb   :  { %v1050_v18 = vadd.f32 %v1049_v7, %v1042_v15  ;;  %v1047_v19 = vpop.f32.mrb[11].mxu0  ;;  %v1252_v17 = vld [vmem:[#allocation3 + $0x300] sm:$0xff] }
 0x3bc   :  { %v1056_v20 = vadd.f32 %v1055_v16, %v1044_v13  ;;  %v1537_v16 = vmov 0.0   ;;  %v1256_v19 = vld [vmem:[#allocation3 + $0x340] sm:$0xff] }
 0x3bd   :  { %v1051_v21 = vrot.slane %v1050_v18, 2  ;;  %1386 = vmatprep.subr.bf16.mxu1 %v1537_v16 }
 0x3be   :  { %v1057_v22 = vrot.slane %v1056_v20, 2 }
 0x3bf   :  { %v1052_v23 = vadd.f32 %v1051_v21, %v1050_v18  ;;  %v1253_v18 = vld [vmem:[#allocation3 + $0x310] sm:$0xff]  ;;  %v1258_v21 = vld [vmem:[#allocation3 + $0x360] sm:$0xff] }
 0x3c0   :  { %v1058_v24 = vadd.f32 %v1057_v22, %v1056_v20  ;;  %v1257_v20 = vld [vmem:[#allocation3 + $0x350] sm:$0xff] }
 0x3c1   :  { %v1053_v27 = vrot.slane %v1052_v23, 1  ;;  %v1259_v22 = vld [vmem:[#allocation3 + $0x370] sm:$0xff] }
 0x3c2   :  { %v1059_v28 = vrot.slane %v1058_v24, 1 }
 0x3c3   :  { %v1054_v29 = vadd.f32 %v1053_v27, %v1052_v23 }
 0x3c4   :  { %v1060_v30 = vadd.f32 %v1059_v28, %v1058_v24 }
 0x3c5   :  { %v1061_v31 = vmul.f32 0.125, %v1054_v29 }
 0x3c6   :  { %v1062_v32 = vmul.f32 0.125, %v1060_v30 }
 0x3c7   :  { %v1063_v33 = vsub.f32 %v1042_v15, %v1061_v31 }
 0x3c8   :  { %v1064_v34 = vsub.f32 %v1044_v13, %v1062_v32 }
 0x3c9   :  { %v1065_v35 = vmul.f32 %v1063_v33, %v1063_v33 }
 0x3ca   :  { %v1066_v36 = vmul.f32 %v1064_v34, %v1064_v34 }
 0x3cb   :  { %v1067_v63 = vrot.slane %v1065_v35, 4 }
 0x3cc   :  { %v1073_v2 = vrot.slane %v1066_v36, 4 }
 0x3cd   :  { %v1068_v25 = vadd.f32 %v1067_v63, %v1065_v35 }
 0x3ce   :  { %v1074_v3 = vadd.f32 %v1073_v2, %v1066_v36 }
 0x3cf   :  { %v1069_v6 = vrot.slane %v1068_v25, 2 }
 0x3d0   :  { %v1075_v26 = vrot.slane %v1074_v3, 2 }
 0x3d1   :  { %v1070_v37 = vadd.f32 %v1069_v6, %v1068_v25 }
 0x3d2   :  { %v1076_v38 = vadd.f32 %v1075_v26, %v1074_v3 }
 0x3d3   :  { %v1071_v39 = vrot.slane %v1070_v37, 1 }
 0x3d4   :  { %v1077_v40 = vrot.slane %v1076_v38, 1 }
 0x3d5   :  { %v1072_v43 = vadd.f32 %v1071_v39, %v1070_v37 }
 0x3d6   :  { %v1078_v45 = vadd.f32 %v1077_v40, %v1076_v38 }
 0x3d7   :  { %v1079_v46 = vmul.f32 0.125, %v1072_v43  ;;  %v1229_v43 = vld [vmem:[%s2172_s7] sm:$0x1]  ;;  %s1539_s7 = smov [#allocation8]  }
 0x3d8   :  { %v1080_v44 = vmul.f32 0.125, %v1078_v45  ;;  %s1314_s19 = sshll.u32 %s1539_s7, 4  ;;  %s1315_s19 = int_to_ptr.vmem [resolvable:$true] %s1314_s19 }
 0x3d9   :  { %v1082_v47 = vadd.f32 1e-05, %v1079_v46  ;;  %p1492_p9 = scmp.lt.s32.totalorder %s1315_s19, %s1315_s19 }
 0x3da   :  { %v1083_v48 = vadd.f32 1e-05, %v1080_v44  ;;  %v1233_v44 = vld [vmem:[%s2173_s8] sm:$0x1]  ;;  %s1487_s8 = scalar_lea.vmem %s1315_s19, 128 }
 0x3db   :  { %1459 = vrsqrt.f32 %v1082_v47  ;;  %p1488_p8 = scmp.ne.s32.totalorder %s1315_s19, %s1487_s8  ;;  %p1493_p10 = scmp.lt.s32.totalorder %s1487_s8, %s1487_s8 }
 0x3dc   :  { %1461 = vrsqrt.f32 %v1083_v48 }
 0x3dd   :  { %p1494_p11 = por %p1493_p10, %p1492_p9 }
 0x3df   :  { %p1495_p12 = pnand %p1494_p11, %p1488_p8 }
 0x3e5   :  { %v1460_v49 = vpop.eup %1459 }
 0x3e6   :  { %v1462_v50 = vpop.eup %1461 }
 0x3e7   :  { %v1088_v51 = vcombine.low %v1460_v49, %v1462_v50 }
 0x3e9   :  { %v1095_v52 = vrot.slane %v1088_v51, %v2082_v61 }
 0x3eb   :  { %v1102_v54 = vrot.slane %v1095_v52, %v2082_v61 }
 0x3ed   :  { %v1104_v55 = vmul.f32 %v1102_v54, %v1081_v53 }
 0x3ef   :  { %v1110_v58 = vrot.slane %v1104_v55, %v2089_v11  ;;  %v1114_v59 = vrot.slane %v1104_v55, %v2092_v14  ;;  %v1351_v55 = vld [vmem:[%s2174_s9] ss:$0 sm:$0xff] }
 0x3f1   :  { %v1117_v62 = vmul.f32 %v1110_v58, %v1061_v31  ;;  %v1118_v5 = vmul.f32 %v1114_v59, %v1062_v32  ;;  %v1139_v9 = vmul.f32 %v1114_v59, %v1044_v13  ;;  %v1138_v60 = vmul.f32 %v1110_v58, %v1042_v15 }
 0x3f3   :  { %v1121_v0 = vcombine.low %v1117_v62, %v1118_v5 }
 0x3f5   :  { %v1128_v1 = vrot.slane %v1121_v0, %v2082_v61 }
 0x3f7   :  { %v1135_v42 = vrot.slane %v1128_v1, %v2082_v61  ;;  %v1254_v61 = vld [vmem:[#allocation3 + $0x320] sm:$0xff] }
 0x3f9   :  { %v1137_v12 = vsub.f32 %v1105_v41, %v1135_v42 }
 0x3fb   :  { %v1148_v56 = vrot.slane %v1137_v12, %v2092_v14  ;;  %v1144_v57 = vrot.slane %v1137_v12, %v2089_v11  ;;  %v1255_v14 = vld [vmem:[#allocation3 + $0x330] sm:$0xff] }
 0x3fd   :  { %v1152_v4 = vadd.f32 %v1148_v56, %v1139_v9  ;;  %v1151_v8 = vadd.f32 %v1144_v57, %v1138_v60 }
 0x3ff   :  { %v1154_v10 = vmax.f32 %v1152_v4, 0.0  ;;  %v1153_v7 = vmax.f32 %v1151_v8, 0.0 }
 0x401   :  { %v1156_v13 = vpack.c.bf16 %v1154_v10, %v1154_v10  ;;  %v1155_v15 = vpack.c.bf16 %v1153_v7, %v1153_v7 }
 0x403   :  { %1205 = vmatprep.mubr.bf16.mxu1 %v1156_v13 }
 0x404   :  { %1206 = vmatmul.mubr.bf16.vlgmr.msra.gmra.mrb[8].mxu1 %v1155_v15 }
 0x405   :  { %1387 = vmatpush3.bf16.msra.mxu1 %v1252_v17  ;;  %1402 = vmatprep.mubr.msk.bf16.mxu1 %vm1538_vm1, %v1537_v16 }
 0x406   :  { %1388 = vmatprep.subr.bf16.mxu1 %v1537_v16 }
 0x409   :  { %1389 = vmatpush3.bf16.msra.mxu1 %v1253_v18 }
 0x40a   :  { %1390 = vmatprep.subr.bf16.mxu1 %v1537_v16 }
 0x40d   :  { %1391 = vmatpush3.bf16.msra.mxu1 %v1254_v61 }
 0x40e   :  { %1392 = vmatprep.subr.bf16.mxu1 %v1537_v16 }
 0x411   :  { %1393 = vmatpush3.bf16.msra.mxu1 %v1255_v14 }
 0x412   :  { %1394 = vmatprep.subr.bf16.mxu1 %v1537_v16 }
 0x415   :  { %1395 = vmatpush3.bf16.msra.mxu1 %v1256_v19 }
 0x416   :  { %1396 = vmatprep.subr.bf16.mxu1 %v1537_v16 }
 0x419   :  { %1397 = vmatpush3.bf16.msra.mxu1 %v1257_v20 }
 0x41a   :  { %1398 = vmatprep.subr.bf16.mxu1 %v1537_v16 }
 0x41d   :  { %1399 = vmatpush3.bf16.msra.mxu1 %v1258_v21 }
 0x41e   :  { %1400 = vmatprep.subr.bf16.mxu1 %v1537_v16 }
 0x421   :  { %1401 = vmatpush3.bf16.msra.mxu1 %v1259_v22 }
 0x4d7   :  { %v1371_v23 = vpop.f32.mrb[8].mxu1 }
 0x4d8   :  { %v1372_v24 = vpop.f32.mrb[9].mxu1 }
 0x4d9   :  { %v1373_v27 = vadd.f32 %v1372_v24, %v1371_v23  ;;  %v1374_v28 = vpop.f32.mrb[10].mxu1 }
 0x4da   :  { %v1375_v29 = vpop.f32.mrb[11].mxu1 }
 0x4db   :  { %v1213_v30 = vrot.slane %v1373_v27, 4 }
 0x4dd   :  { %v1214_v31 = vadd.f32 %v1373_v27, %v1213_v30 }
 0x4df   :  { %v1215_v32 = vrot.slane %v1214_v31, 2 }
 0x4e1   :  { %v1216_v33 = vadd.f32 %v1215_v32, %v1214_v31 }
 0x4e3   :  { %v1217_v34 = vrot.slane %v1216_v33, 1 }
 0x4e5   :  { %v1218_v35 = vadd.f32 %v1217_v34, %v1216_v33 }
 0x4e7   :  { %v1219_v36 = vmul.f32 0.125, %v1218_v35 }
 0x4e9   :  { %v1220_v63 = vsub.f32 %v1373_v27, %v1219_v36 }
 0x4eb   :  { %v1221_v2 = vmul.f32 %v1220_v63, %v1220_v63 }
 0x4ed   :  { %v1222_v25 = vrot.slane %v1221_v2, 4 }
 0x4ef   :  { %v1223_v3 = vadd.f32 %v1222_v25, %v1221_v2 }
 0x4f1   :  { %v1224_v6 = vrot.slane %v1223_v3, 2 }
 0x4f3   :  { %v1225_v26 = vadd.f32 %v1224_v6, %v1223_v3 }
 0x4f5   :  { %v1226_v37 = vrot.slane %v1225_v26, 1 }
 0x4f7   :  { %v1227_v38 = vadd.f32 %v1226_v37, %v1225_v26 }
 0x4f9   :  { %v1228_v39 = vmul.f32 0.125, %v1227_v38 }
 0x4fb   :  { %v1230_v40 = vadd.f32 1e-05, %v1228_v39 }
 0x4fd   :  { %1463 = vrsqrt.f32 %v1230_v40 }
 0x507   :  { %v1464_v45 = vpop.eup %1463 }
 0x508   :  { %v1232_v46 = vmul.f32 %v1464_v45, %v1229_v43 }
 0x50a   :  { %v1234_v47 = vmul.f32 %v1232_v46, %v1219_v36  ;;  %v1240_v48 = vrot.slane %v1232_v46, %v2089_v11 }
 0x50c   :  { %v1235_v49 = vsub.f32 %v1233_v44, %v1234_v47  ;;  %v1242_v50 = vmul.f32 %v1373_v27, %v1240_v48 }
 0x50e   :  { %v1247_v51 = vrot.slane %v1235_v49, %v2089_v11 }
 0x510   :  { %v1249_v52 = vadd.f32 %v1247_v51, %v1242_v50 }
 0x512   :  { %v1250_v53 = vmax.f32 %v1249_v52, 0.0 }
 0x514   :  { %v1251_v54 = vpack.c.bf16 %v1250_v53, %v1250_v53 }
 0x516   :  { %1403 = vmatmul.mubr.bf16.vlgmr.msra.gmra.mrb[12].mxu1 %v1251_v54 }
 0x5e9   :  { %v1301_v58 = vpop.f32.mrb[12].mxu1 }
 0x5ea   :  { %v1302_v59 = vadd.f32 %v1351_v55, %v1301_v58  ;;  %v1404_v62 = vpop.f32.mrb[13].mxu1 }
 0x5eb   :  { %v1304_v5 = vpop.f32.mrb[14].mxu1 }
 0x5ec   :  { %1307 = vst [vmem:[#allocation8] sm:$0xff] %v1302_v59  ;;  %v1405_v9 = vpop.f32.mrb[15].mxu1 }
 0x5ed   :  { %1498 = shalt.err (!%p1495_p12)
}
 0x5ee   :  { %s1499_s9 = scalar_lea.hbm %s2175_s10, 128 }
 0x5ef   :  { %p1500_p13 = scmp.ne.s32.totalorder %s2175_s10, %s1499_s9  ;;  %p1503_p0 = scmp.lt.u32.totalorder %s1499_s9, %s2175_s10 }
 0x5f1   :  { %p1505_p1 = pnand %p1503_p0, %p1500_p13 }
 0x5f3   :  { %1508 = shalt.err (!%p1505_p1)
}
 0x5f4   :  { %1317 = dma.vmem_to_hbm [thread:$0]  %s1315_s19, 128, %s2175_s10, [#allocation7]  }
 0x5f5   :  { %1517 = dma.done.wait [#allocation7], 128  }
 0x5f6   :  { %1518 = vsyncadd [#allocation7], 4294967168 }
 0x5f7   :  { %1321 = vsyncpa [#allocation6], 1 }
 0x5f8   :  { %1322 = vsyncpa [#allocation7], 1 }
 0x5f9   :  { %1323 = vsyncmov [#allocation4] }
 0x5fc   :  { %s1324_s1 = vpop.sfrf %1323 }
 0x5fd   :  { %p1352_p2 = scmp.ne.s32.totalorder %s1324_s1, 0 }
 0x5ff   :  { %1328 = shalt.err (%p1352_p2)  }
 0x600   :  { %1330 = vsyncmov [#allocation4 + $0x1] }
 0x603   :  { %s1331_s30 = vpop.sfrf %1330 }
 0x604   :  { %p1353_p3 = scmp.ne.s32.totalorder %s1331_s30, 0 }
 0x606   :  { %1335 = shalt.err (%p1353_p3)  }
 0x607   :  { %1337 = vsyncmov [#allocation4 + $0x2] }
 0x60a   :  { %s1338_s11 = vpop.sfrf %1337 }
 0x60b   :  { %p1354_p4 = scmp.ne.s32.totalorder %s1338_s11, 0 }
 0x60d   :  { %1342 = shalt.err (%p1354_p4)  }

</bundles_post_ra>
